<compile_context>
chip_gen: v7x
topology: tpu7x:2x2x1
jax: 0.10.0
libtpu: 0.0.40
codegen_flags: <defaults>
</compile_context>

<pallas_src>
import functools

import jax
import jax.numpy as jnp
from jax.experimental import pallas as pl
from jax.experimental.pallas import tpu as pltpu


# ----------------------------- planning helpers -----------------------------

def _round_up(x, m):
    return (x + m - 1) // m * m


def _vmem_capacity_bytes():
    try:
        return int(pltpu.get_tpu_info().vmem_capacity_bytes)
    except Exception:
        return 128 << 20  # v5e / v6e physical VMEM; safe default if query fails


def _layer_weight_bytes(layer_params):
    return sum(int(a.size) * a.dtype.itemsize for a in layer_params)


def _budget_bytes(row_tile, llm_dim, audio_dim, weight_bytes):
    # Resident (single-buffered) weights
    # + double-buffered row tiles (based f32 + ref bf16 + out f32)
    # + in-kernel f32 intermediates (hidden/h/value/gate + bf16 casts)
    # + fixed headroom for semaphores / internal scratch.
    tile_bytes = row_tile * (llm_dim * 4 + audio_dim * 2 + llm_dim * 4)
    intermediate_bytes = 6 * row_tile * llm_dim * 4
    return weight_bytes + 2 * tile_bytes + intermediate_bytes + (4 << 20)


def _plan(llm_dim, audio_dim, prepared_params, vmem_capacity):
    """Choose (fuse_all_layers, row_tile) from the VMEM capacity.

    Prefer fusing every layer into one call (no inter-layer HBM round trips);
    fall back to per-layer calls on VMEM-tight chips (v7x: 64 MiB, where
    3 x ~34 MiB of bf16 weights at module dims cannot all be resident).
    row_tile 256 fills the 2x256x256 MXU; drop to 128 when the budget is tight
    (per-step overhead ~0.35us stays negligible vs per-tile MXU time).
    """
    cap = vmem_capacity - (8 << 20)
    fused_w = sum(_layer_weight_bytes(p) for p in prepared_params)
    per_layer_w = max(_layer_weight_bytes(p) for p in prepared_params)
    for fuse, wbytes in ((True, fused_w), (False, per_layer_w)):
        for rt in (256, 128):
            if _budget_bytes(rt, llm_dim, audio_dim, wbytes) <= cap:
                return fuse, rt
    return False, 128  # last resort; per-call budget is recomputed anyway


# --------------------------------- kernel -----------------------------------

def _fusion_kernel(num_layers, based_ref, ref_ref, *rest):
    """num_layers fused _AdaptedFFN layers for one tile of rows (tokens)."""
    out_ref = rest[-1]
    w = rest[:-1]                                    # 9 weight refs per layer

    hidden = based_ref[...].astype(jnp.float32)      # f32 carried across layers
    ref_bf16 = ref_ref[...]                          # already bf16

    for layer in range(num_layers):
        (w0b, w0r, b0, w1, b1, w2, b2, wv, bv) = w[9 * layer:9 * (layer + 1)]
        based_f32 = hidden                           # residual input, f32

        # mix_layers[0]: Linear(llm+audio -> llm), concat split in two matmuls.
        h = (jnp.dot(based_f32.astype(jnp.bfloat16), w0b[...],
                     preferred_element_type=jnp.float32)
             + jnp.dot(ref_bf16, w0r[...], preferred_element_type=jnp.float32)
             + b0[...])
        # mix_layers[1], mix_layers[2]: Linear(llm -> llm).
        h = (jnp.dot(h.astype(jnp.bfloat16), w1[...],
                     preferred_element_type=jnp.float32) + b1[...])
        h = (jnp.dot(h.astype(jnp.bfloat16), w2[...],
                     preferred_element_type=jnp.float32) + b2[...])

        # value_linear(ref): computed right before the epilogue so the f32
        # result doesn't pin a live range across the whole gate chain.
        value = (jnp.dot(ref_bf16, wv[...], preferred_element_type=jnp.float32)
                 + bv[...])

        hidden = based_f32 + jax.nn.sigmoid(h) * value   # f32 gating / residual

    out_ref[...] = hidden.astype(out_ref.dtype)


def _fused_adapted_ffn(based, ref_bf16, layer_params, *, row_tile, vmem_capacity):
    """Run `len(layer_params)` fused _AdaptedFFN layers over (N, llm_dim) rows."""
    n, llm_dim = based.shape
    audio_dim = ref_bf16.shape[1]
    num_layers = len(layer_params)

    # Don't use a tile larger than needed for tiny inputs (keep 8-row align).
    rt = min(row_tile, max(8, _round_up(n, 8)))
    grid = (pl.cdiv(n, rt),)                 # ragged last tile is masked by Pallas

    def row_spec(dim):
        return pl.BlockSpec((rt, dim), lambda i: (i, 0))

    def const_spec(shape):
        # Grid-invariant block: single-buffer so the pipeliner keeps exactly
        # one resident copy (critical for VMEM at module-scale dims).
        return pl.BlockSpec(shape, lambda i: (0, 0), pipeline_mode=pl.Buffered(1))

    flat_weights, weight_specs = [], []
    for p in layer_params:
        for a in p:
            flat_weights.append(a)
            weight_specs.append(const_spec(a.shape))

    weight_bytes = sum(int(a.size) * a.dtype.itemsize for a in flat_weights)
    vmem_limit = int(min(max(_budget_bytes(rt, llm_dim, audio_dim, weight_bytes),
                             32 << 20),
                         vmem_capacity - (8 << 20)))

    flops = 2 * n * num_layers * (3 * llm_dim * llm_dim + 2 * audio_dim * llm_dim)
    cost = pl.CostEstimate(
        flops=flops,
        transcendentals=2 * n * llm_dim * num_layers,     # sigmoid ~= exp + recip
        bytes_accessed=(weight_bytes
                        + n * (llm_dim * 4 + audio_dim * 2 + llm_dim * 4)))

    return pl.pallas_call(
        functools.partial(_fusion_kernel, num_layers),
        out_shape=jax.ShapeDtypeStruct((n, llm_dim), based.dtype),
        grid_spec=pltpu.PrefetchScalarGridSpec(
            num_scalar_prefetch=0,
            grid=grid,
            in_specs=[row_spec(llm_dim), row_spec(audio_dim)] + weight_specs,
            out_specs=row_spec(llm_dim)),
        compiler_params=pltpu.CompilerParams(
            dimension_semantics=("parallel",),
            vmem_limit_bytes=vmem_limit),
        cost_estimate=cost,
    )(based, ref_bf16, *flat_weights)


# ------------------------------ public wrappers ------------------------------

def prepare_fusion_params(all_params_f32):
    """One-time conversion of module weights to the kernel layout.

    Matmul weights -> bf16 (full-rate MXU, half the DMA/VMEM); biases stay f32
    (added to the f32 accumulator).  Call this once at init / per train step,
    NOT inside the forward (perf-review item: removes per-forward converts).
    """
    prepared = []
    for (w0b, w0r, b0, w1, b1, w2, b2, wv, bv) in all_params_f32:
        prepared.append((
            w0b.astype(jnp.bfloat16), w0r.astype(jnp.bfloat16),
            b0.astype(jnp.float32),
            w1.astype(jnp.bfloat16), b1.astype(jnp.float32),
            w2.astype(jnp.bfloat16), b2.astype(jnp.float32),
            wv.astype(jnp.bfloat16), bv.astype(jnp.float32)))
    return prepared


def reference_mix_fusion(text_embeds, audio_embeds, prepared_params, *,
                         fuse=None, row_tile=None):
    """text_embeds: (B,S,llm_dim) f32; audio_embeds: (B,S,audio_dim).

    prepared_params: list (one entry per _AdaptedFFN layer) of 9-tuples from
    prepare_fusion_params().  fuse/row_tile=None -> chosen from VMEM capacity.
    """
    b, s, llm_dim = text_embeds.shape
    audio_dim = audio_embeds.shape[-1]
    n = b * s
    based = text_embeds.reshape(n, llm_dim)
    # ref is only ever a matmul operand -> cast once, reused by every layer.
    ref = audio_embeds.reshape(n, audio_dim).astype(jnp.bfloat16)

    vmem_capacity = _vmem_capacity_bytes()
    auto_fuse, auto_rt = _plan(llm_dim, audio_dim, prepared_params, vmem_capacity)
    fuse = auto_fuse if fuse is None else fuse
    row_tile = auto_rt if row_tile is None else row_tile

    if fuse:
        out = _fused_adapted_ffn(based, ref, list(prepared_params),
                                 row_tile=row_tile, vmem_capacity=vmem_capacity)
    else:
        # Per-layer path for VMEM-tight chips (v7x: all-layer weights > 64 MiB).
        # TODO(synk): v7x-only follow-ups not implemented here: cross-call
        # weight prefetch (P10) to hide the per-layer ~34 MiB prologue, and
        # sharing the invariant weight blocks between the two TensorCores
        # (VMEM_SHARED / core_map) instead of one resident copy per core.
        hidden = based
        for p in prepared_params:
            hidden = _fused_adapted_ffn(hidden, ref, [p],
                                        row_tile=row_tile,
                                        vmem_capacity=vmem_capacity)
        out = hidden
    return out.reshape(b, s, llm_dim)


def init_adapted_ffn_params(key, llm_dim, audio_dim):
    """Deterministic synthetic f32 weights. Layout (in, out); biases (1, out)."""
    ks = jax.random.split(key, 9)
    scale = 0.05
    w0b = scale * jax.random.normal(ks[0], (llm_dim, llm_dim), jnp.float32)
    w0r = scale * jax.random.normal(ks[1], (audio_dim, llm_dim), jnp.float32)
    b0 = scale * jax.random.normal(ks[2], (1, llm_dim), jnp.float32)
    w1 = scale * jax.random.normal(ks[3], (llm_dim, llm_dim), jnp.float32)
    b1 = scale * jax.random.normal(ks[4], (1, llm_dim), jnp.float32)
    w2 = scale * jax.random.normal(ks[5], (llm_dim, llm_dim), jnp.float32)
    b2 = scale * jax.random.normal(ks[6], (1, llm_dim), jnp.float32)
    wv = scale * jax.random.normal(ks[7], (audio_dim, llm_dim), jnp.float32)
    bv = scale * jax.random.normal(ks[8], (1, llm_dim), jnp.float32)
    return (w0b, w0r, b0, w1, b1, w2, b2, wv, bv)


# ----------------------------- pure-JAX reference ----------------------------

def _adapted_ffn_ref(based, ref, params):
    w0b, w0r, b0, w1, b1, w2, b2, wv, bv = params
    h = based @ w0b + ref @ w0r + b0
    h = h @ w1 + b1
    h = h @ w2 + b2
    return based + jax.nn.sigmoid(h) * (ref @ wv + bv)


def _fusion_ref(text_embeds, audio_embeds, all_params):
    b, s, llm_dim = text_embeds.shape
    based = text_embeds.reshape(b * s, llm_dim)
    ref = audio_embeds.reshape(b * s, -1)
    hidden = based
    for params in all_params:
        hidden = _adapted_ffn_ref(hidden, ref, params)
    return hidden.reshape(b, s, llm_dim)


if __name__ == "__main__":
    # Small, module-consistent shapes (module defaults: llm=2048, audio=1280).
    B, S = 2, 8
    LLM_DIM, AUDIO_DIM = 64, 32
    NUM_LAYERS = 3

    key = jax.random.PRNGKey(0)
    k_text, k_audio, k_params = jax.random.split(key, 3)
    text_embeds = jax.random.normal(k_text, (B, S, LLM_DIM), jnp.float32)
    audio_embeds = jax.random.normal(k_audio, (B, S, AUDIO_DIM), jnp.float32)

    layer_keys = jax.random.split(k_params, NUM_LAYERS)
    all_params = [init_adapted_ffn_params(k, LLM_DIM, AUDIO_DIM)
                  for k in layer_keys]
    prepared = prepare_fusion_params(all_params)   # one-time bf16 conversion

    expected = _fusion_ref(text_embeds, audio_embeds, all_params)

    # Auto plan (fused on 128 MiB-VMEM chips; per-layer on v7x) ...
    out_auto = jax.block_until_ready(
        reference_mix_fusion(text_embeds, audio_embeds, prepared))
    # ... and force the per-layer path too, so both code paths are exercised.
    out_split = jax.block_until_ready(
        reference_mix_fusion(text_embeds, audio_embeds, prepared, fuse=False))

    assert out_auto.shape == (B, S, LLM_DIM)
    assert out_split.shape == (B, S, LLM_DIM)

    # bf16 matmul operands (f32 accumulation) vs the pure-f32 reference ->
    # loosened tolerance; semantics otherwise match the PyTorch module.
    for name, out in (("fused/auto", out_auto), ("per-layer", out_split)):
        max_err = float(jnp.max(jnp.abs(out - expected)))
        assert jnp.allclose(out, expected, atol=3e-2, rtol=3e-2), (
            f"{name} mismatch vs JAX reference (max |err| = {max_err})")

    print("KERNEL_OK")
</pallas_src>

<mosaic_0001>
module attributes {stable_mosaic.version = 11 : i64} {
  func.func @_fusion_kernel(%arg0: i32, %arg1: memref<16x64xf32, #tpu.memory_space<vmem>>, %arg2: memref<16x32xbf16, #tpu.memory_space<vmem>>, %arg3: memref<64x64xbf16, #tpu.memory_space<vmem>>, %arg4: memref<32x64xbf16, #tpu.memory_space<vmem>>, %arg5: memref<1x64xf32, #tpu.memory_space<vmem>>, %arg6: memref<64x64xbf16, #tpu.memory_space<vmem>>, %arg7: memref<1x64xf32, #tpu.memory_space<vmem>>, %arg8: memref<64x64xbf16, #tpu.memory_space<vmem>>, %arg9: memref<1x64xf32, #tpu.memory_space<vmem>>, %arg10: memref<32x64xbf16, #tpu.memory_space<vmem>>, %arg11: memref<1x64xf32, #tpu.memory_space<vmem>>, %arg12: memref<64x64xbf16, #tpu.memory_space<vmem>>, %arg13: memref<32x64xbf16, #tpu.memory_space<vmem>>, %arg14: memref<1x64xf32, #tpu.memory_space<vmem>>, %arg15: memref<64x64xbf16, #tpu.memory_space<vmem>>, %arg16: memref<1x64xf32, #tpu.memory_space<vmem>>, %arg17: memref<64x64xbf16, #tpu.memory_space<vmem>>, %arg18: memref<1x64xf32, #tpu.memory_space<vmem>>, %arg19: memref<32x64xbf16, #tpu.memory_space<vmem>>, %arg20: memref<1x64xf32, #tpu.memory_space<vmem>>, %arg21: memref<64x64xbf16, #tpu.memory_space<vmem>>, %arg22: memref<32x64xbf16, #tpu.memory_space<vmem>>, %arg23: memref<1x64xf32, #tpu.memory_space<vmem>>, %arg24: memref<64x64xbf16, #tpu.memory_space<vmem>>, %arg25: memref<1x64xf32, #tpu.memory_space<vmem>>, %arg26: memref<64x64xbf16, #tpu.memory_space<vmem>>, %arg27: memref<1x64xf32, #tpu.memory_space<vmem>>, %arg28: memref<32x64xbf16, #tpu.memory_space<vmem>>, %arg29: memref<1x64xf32, #tpu.memory_space<vmem>>, %arg30: memref<16x64xf32, #tpu.memory_space<vmem>>) attributes {dimension_semantics = [#tpu.dimension_semantics<parallel>], iteration_bounds = array<i64: 1>, scalar_prefetch = 0 : i64, scratch_operands = 0 : i64, tpu.core_type = #tpu.core_type<tc>, window_params = [{transform_indices = @transform_0, window_bounds = array<i64: 16, 64>}, {transform_indices = @transform_1, window_bounds = array<i64: 16, 32>}, {pipeline_mode = #tpu.pipeline_mode<synchronous>, transform_indices = @transform_2, window_bounds = array<i64: 64, 64>}, {pipeline_mode = #tpu.pipeline_mode<synchronous>, transform_indices = @transform_3, window_bounds = array<i64: 32, 64>}, {pipeline_mode = #tpu.pipeline_mode<synchronous>, transform_indices = @transform_4, window_bounds = array<i64: 1, 64>}, {pipeline_mode = #tpu.pipeline_mode<synchronous>, transform_indices = @transform_5, window_bounds = array<i64: 64, 64>}, {pipeline_mode = #tpu.pipeline_mode<synchronous>, transform_indices = @transform_6, window_bounds = array<i64: 1, 64>}, {pipeline_mode = #tpu.pipeline_mode<synchronous>, transform_indices = @transform_7, window_bounds = array<i64: 64, 64>}, {pipeline_mode = #tpu.pipeline_mode<synchronous>, transform_indices = @transform_8, window_bounds = array<i64: 1, 64>}, {pipeline_mode = #tpu.pipeline_mode<synchronous>, transform_indices = @transform_9, window_bounds = array<i64: 32, 64>}, {pipeline_mode = #tpu.pipeline_mode<synchronous>, transform_indices = @transform_10, window_bounds = array<i64: 1, 64>}, {pipeline_mode = #tpu.pipeline_mode<synchronous>, transform_indices = @transform_11, window_bounds = array<i64: 64, 64>}, {pipeline_mode = #tpu.pipeline_mode<synchronous>, transform_indices = @transform_12, window_bounds = array<i64: 32, 64>}, {pipeline_mode = #tpu.pipeline_mode<synchronous>, transform_indices = @transform_13, window_bounds = array<i64: 1, 64>}, {pipeline_mode = #tpu.pipeline_mode<synchronous>, transform_indices = @transform_14, window_bounds = array<i64: 64, 64>}, {pipeline_mode = #tpu.pipeline_mode<synchronous>, transform_indices = @transform_15, window_bounds = array<i64: 1, 64>}, {pipeline_mode = #tpu.pipeline_mode<synchronous>, transform_indices = @transform_16, window_bounds = array<i64: 64, 64>}, {pipeline_mode = #tpu.pipeline_mode<synchronous>, transform_indices = @transform_17, window_bounds = array<i64: 1, 64>}, {pipeline_mode = #tpu.pipeline_mode<synchronous>, transform_indices = @transform_18, window_bounds = array<i64: 32, 64>}, {pipeline_mode = #tpu.pipeline_mode<synchronous>, transform_indices = @transform_19, window_bounds = array<i64: 1, 64>}, {pipeline_mode = #tpu.pipeline_mode<synchronous>, transform_indices = @transform_20, window_bounds = array<i64: 64, 64>}, {pipeline_mode = #tpu.pipeline_mode<synchronous>, transform_indices = @transform_21, window_bounds = array<i64: 32, 64>}, {pipeline_mode = #tpu.pipeline_mode<synchronous>, transform_indices = @transform_22, window_bounds = array<i64: 1, 64>}, {pipeline_mode = #tpu.pipeline_mode<synchronous>, transform_indices = @transform_23, window_bounds = array<i64: 64, 64>}, {pipeline_mode = #tpu.pipeline_mode<synchronous>, transform_indices = @transform_24, window_bounds = array<i64: 1, 64>}, {pipeline_mode = #tpu.pipeline_mode<synchronous>, transform_indices = @transform_25, window_bounds = array<i64: 64, 64>}, {pipeline_mode = #tpu.pipeline_mode<synchronous>, transform_indices = @transform_26, window_bounds = array<i64: 1, 64>}, {pipeline_mode = #tpu.pipeline_mode<synchronous>, transform_indices = @transform_27, window_bounds = array<i64: 32, 64>}, {pipeline_mode = #tpu.pipeline_mode<synchronous>, transform_indices = @transform_28, window_bounds = array<i64: 1, 64>}, {transform_indices = @transform_29, window_bounds = array<i64: 16, 64>}]} {
    %c0 = arith.constant 0 : index
    %c0_0 = arith.constant 0 : index
    %0 = vector.load %arg1[%c0, %c0_0] : memref<16x64xf32, #tpu.memory_space<vmem>>, vector<16x64xf32>
    %c0_1 = arith.constant 0 : index
    %c0_2 = arith.constant 0 : index
    %1 = vector.load %arg2[%c0_1, %c0_2] : memref<16x32xbf16, #tpu.memory_space<vmem>>, vector<16x32xbf16>
    %2 = arith.truncf %0 : vector<16x64xf32> to vector<16x64xbf16>
    %c0_3 = arith.constant 0 : index
    %c0_4 = arith.constant 0 : index
    %3 = vector.load %arg3[%c0_3, %c0_4] : memref<64x64xbf16, #tpu.memory_space<vmem>>, vector<64x64xbf16>
    %cst = arith.constant dense<0.000000e+00> : vector<16x64xf32>
    %4 = tpu.matmul %2, %3, %cst {dimension_numbers = #tpu.dot_dimension_numbers<[1], [0], [0], [1], [0, 0, 1, 1], [], []>} : vector<16x64xbf16>, vector<64x64xbf16>, vector<16x64xf32> -> vector<16x64xf32>
    %c0_5 = arith.constant 0 : index
    %c0_6 = arith.constant 0 : index
    %5 = vector.load %arg4[%c0_5, %c0_6] : memref<32x64xbf16, #tpu.memory_space<vmem>>, vector<32x64xbf16>
    %cst_7 = arith.constant dense<0.000000e+00> : vector<16x64xf32>
    %6 = tpu.matmul %1, %5, %cst_7 {dimension_numbers = #tpu.dot_dimension_numbers<[1], [0], [0], [1], [0, 0, 1, 1], [], []>} : vector<16x32xbf16>, vector<32x64xbf16>, vector<16x64xf32> -> vector<16x64xf32>
    %7 = arith.addf %4, %6 : vector<16x64xf32>
    %c0_8 = arith.constant 0 : index
    %c0_9 = arith.constant 0 : index
    %8 = vector.load %arg5[%c0_8, %c0_9] : memref<1x64xf32, #tpu.memory_space<vmem>>, vector<1x64xf32>
    %9 = vector.broadcast %8 : vector<1x64xf32> to vector<16x64xf32>
    %10 = arith.addf %7, %9 : vector<16x64xf32>
    %11 = arith.truncf %10 : vector<16x64xf32> to vector<16x64xbf16>
    %c0_10 = arith.constant 0 : index
    %c0_11 = arith.constant 0 : index
    %12 = vector.load %arg6[%c0_10, %c0_11] : memref<64x64xbf16, #tpu.memory_space<vmem>>, vector<64x64xbf16>
    %cst_12 = arith.constant dense<0.000000e+00> : vector<16x64xf32>
    %13 = tpu.matmul %11, %12, %cst_12 {dimension_numbers = #tpu.dot_dimension_numbers<[1], [0], [0], [1], [0, 0, 1, 1], [], []>} : vector<16x64xbf16>, vector<64x64xbf16>, vector<16x64xf32> -> vector<16x64xf32>
    %c0_13 = arith.constant 0 : index
    %c0_14 = arith.constant 0 : index
    %14 = vector.load %arg7[%c0_13, %c0_14] : memref<1x64xf32, #tpu.memory_space<vmem>>, vector<1x64xf32>
    %15 = vector.broadcast %14 : vector<1x64xf32> to vector<16x64xf32>
    %16 = arith.addf %13, %15 : vector<16x64xf32>
    %17 = arith.truncf %16 : vector<16x64xf32> to vector<16x64xbf16>
    %c0_15 = arith.constant 0 : index
    %c0_16 = arith.constant 0 : index
    %18 = vector.load %arg8[%c0_15, %c0_16] : memref<64x64xbf16, #tpu.memory_space<vmem>>, vector<64x64xbf16>
    %cst_17 = arith.constant dense<0.000000e+00> : vector<16x64xf32>
    %19 = tpu.matmul %17, %18, %cst_17 {dimension_numbers = #tpu.dot_dimension_numbers<[1], [0], [0], [1], [0, 0, 1, 1], [], []>} : vector<16x64xbf16>, vector<64x64xbf16>, vector<16x64xf32> -> vector<16x64xf32>
    %c0_18 = arith.constant 0 : index
    %c0_19 = arith.constant 0 : index
    %20 = vector.load %arg9[%c0_18, %c0_19] : memref<1x64xf32, #tpu.memory_space<vmem>>, vector<1x64xf32>
    %21 = vector.broadcast %20 : vector<1x64xf32> to vector<16x64xf32>
    %22 = arith.addf %19, %21 : vector<16x64xf32>
    %c0_20 = arith.constant 0 : index
    %c0_21 = arith.constant 0 : index
    %23 = vector.load %arg10[%c0_20, %c0_21] : memref<32x64xbf16, #tpu.memory_space<vmem>>, vector<32x64xbf16>
    %cst_22 = arith.constant dense<0.000000e+00> : vector<16x64xf32>
    %24 = tpu.matmul %1, %23, %cst_22 {dimension_numbers = #tpu.dot_dimension_numbers<[1], [0], [0], [1], [0, 0, 1, 1], [], []>} : vector<16x32xbf16>, vector<32x64xbf16>, vector<16x64xf32> -> vector<16x64xf32>
    %c0_23 = arith.constant 0 : index
    %c0_24 = arith.constant 0 : index
    %25 = vector.load %arg11[%c0_23, %c0_24] : memref<1x64xf32, #tpu.memory_space<vmem>>, vector<1x64xf32>
    %26 = vector.broadcast %25 : vector<1x64xf32> to vector<16x64xf32>
    %27 = arith.addf %24, %26 : vector<16x64xf32>
    %28 = arith.negf %22 : vector<16x64xf32>
    %29 = math.exp %28 : vector<16x64xf32>
    %cst_25 = arith.constant 1.000000e+00 : f32
    %30 = vector.broadcast %cst_25 : f32 to vector<16x64xf32>
    %31 = arith.addf %30, %29 : vector<16x64xf32>
    %32 = arith.divf %30, %31 : vector<16x64xf32>
    %33 = arith.mulf %32, %27 : vector<16x64xf32>
    %34 = arith.addf %0, %33 : vector<16x64xf32>
    %35 = arith.truncf %34 : vector<16x64xf32> to vector<16x64xbf16>
    %c0_26 = arith.constant 0 : index
    %c0_27 = arith.constant 0 : index
    %36 = vector.load %arg12[%c0_26, %c0_27] : memref<64x64xbf16, #tpu.memory_space<vmem>>, vector<64x64xbf16>
    %cst_28 = arith.constant dense<0.000000e+00> : vector<16x64xf32>
    %37 = tpu.matmul %35, %36, %cst_28 {dimension_numbers = #tpu.dot_dimension_numbers<[1], [0], [0], [1], [0, 0, 1, 1], [], []>} : vector<16x64xbf16>, vector<64x64xbf16>, vector<16x64xf32> -> vector<16x64xf32>
    %c0_29 = arith.constant 0 : index
    %c0_30 = arith.constant 0 : index
    %38 = vector.load %arg13[%c0_29, %c0_30] : memref<32x64xbf16, #tpu.memory_space<vmem>>, vector<32x64xbf16>
    %cst_31 = arith.constant dense<0.000000e+00> : vector<16x64xf32>
    %39 = tpu.matmul %1, %38, %cst_31 {dimension_numbers = #tpu.dot_dimension_numbers<[1], [0], [0], [1], [0, 0, 1, 1], [], []>} : vector<16x32xbf16>, vector<32x64xbf16>, vector<16x64xf32> -> vector<16x64xf32>
    %40 = arith.addf %37, %39 : vector<16x64xf32>
    %c0_32 = arith.constant 0 : index
    %c0_33 = arith.constant 0 : index
    %41 = vector.load %arg14[%c0_32, %c0_33] : memref<1x64xf32, #tpu.memory_space<vmem>>, vector<1x64xf32>
    %42 = vector.broadcast %41 : vector<1x64xf32> to vector<16x64xf32>
    %43 = arith.addf %40, %42 : vector<16x64xf32>
    %44 = arith.truncf %43 : vector<16x64xf32> to vector<16x64xbf16>
    %c0_34 = arith.constant 0 : index
    %c0_35 = arith.constant 0 : index
    %45 = vector.load %arg15[%c0_34, %c0_35] : memref<64x64xbf16, #tpu.memory_space<vmem>>, vector<64x64xbf16>
    %cst_36 = arith.constant dense<0.000000e+00> : vector<16x64xf32>
    %46 = tpu.matmul %44, %45, %cst_36 {dimension_numbers = #tpu.dot_dimension_numbers<[1], [0], [0], [1], [0, 0, 1, 1], [], []>} : vector<16x64xbf16>, vector<64x64xbf16>, vector<16x64xf32> -> vector<16x64xf32>
    %c0_37 = arith.constant 0 : index
    %c0_38 = arith.constant 0 : index
    %47 = vector.load %arg16[%c0_37, %c0_38] : memref<1x64xf32, #tpu.memory_space<vmem>>, vector<1x64xf32>
    %48 = vector.broadcast %47 : vector<1x64xf32> to vector<16x64xf32>
    %49 = arith.addf %46, %48 : vector<16x64xf32>
    %50 = arith.truncf %49 : vector<16x64xf32> to vector<16x64xbf16>
    %c0_39 = arith.constant 0 : index
    %c0_40 = arith.constant 0 : index
    %51 = vector.load %arg17[%c0_39, %c0_40] : memref<64x64xbf16, #tpu.memory_space<vmem>>, vector<64x64xbf16>
    %cst_41 = arith.constant dense<0.000000e+00> : vector<16x64xf32>
    %52 = tpu.matmul %50, %51, %cst_41 {dimension_numbers = #tpu.dot_dimension_numbers<[1], [0], [0], [1], [0, 0, 1, 1], [], []>} : vector<16x64xbf16>, vector<64x64xbf16>, vector<16x64xf32> -> vector<16x64xf32>
    %c0_42 = arith.constant 0 : index
    %c0_43 = arith.constant 0 : index
    %53 = vector.load %arg18[%c0_42, %c0_43] : memref<1x64xf32, #tpu.memory_space<vmem>>, vector<1x64xf32>
    %54 = vector.broadcast %53 : vector<1x64xf32> to vector<16x64xf32>
    %55 = arith.addf %52, %54 : vector<16x64xf32>
    %c0_44 = arith.constant 0 : index
    %c0_45 = arith.constant 0 : index
    %56 = vector.load %arg19[%c0_44, %c0_45] : memref<32x64xbf16, #tpu.memory_space<vmem>>, vector<32x64xbf16>
    %cst_46 = arith.constant dense<0.000000e+00> : vector<16x64xf32>
    %57 = tpu.matmul %1, %56, %cst_46 {dimension_numbers = #tpu.dot_dimension_numbers<[1], [0], [0], [1], [0, 0, 1, 1], [], []>} : vector<16x32xbf16>, vector<32x64xbf16>, vector<16x64xf32> -> vector<16x64xf32>
    %c0_47 = arith.constant 0 : index
    %c0_48 = arith.constant 0 : index
    %58 = vector.load %arg20[%c0_47, %c0_48] : memref<1x64xf32, #tpu.memory_space<vmem>>, vector<1x64xf32>
    %59 = vector.broadcast %58 : vector<1x64xf32> to vector<16x64xf32>
    %60 = arith.addf %57, %59 : vector<16x64xf32>
    %61 = arith.negf %55 : vector<16x64xf32>
    %62 = math.exp %61 : vector<16x64xf32>
    %cst_49 = arith.constant 1.000000e+00 : f32
    %63 = vector.broadcast %cst_49 : f32 to vector<16x64xf32>
    %64 = arith.addf %63, %62 : vector<16x64xf32>
    %65 = arith.divf %63, %64 : vector<16x64xf32>
    %66 = arith.mulf %65, %60 : vector<16x64xf32>
    %67 = arith.addf %34, %66 : vector<16x64xf32>
    %68 = arith.truncf %67 : vector<16x64xf32> to vector<16x64xbf16>
    %c0_50 = arith.constant 0 : index
    %c0_51 = arith.constant 0 : index
    %69 = vector.load %arg21[%c0_50, %c0_51] : memref<64x64xbf16, #tpu.memory_space<vmem>>, vector<64x64xbf16>
    %cst_52 = arith.constant dense<0.000000e+00> : vector<16x64xf32>
    %70 = tpu.matmul %68, %69, %cst_52 {dimension_numbers = #tpu.dot_dimension_numbers<[1], [0], [0], [1], [0, 0, 1, 1], [], []>} : vector<16x64xbf16>, vector<64x64xbf16>, vector<16x64xf32> -> vector<16x64xf32>
    %c0_53 = arith.constant 0 : index
    %c0_54 = arith.constant 0 : index
    %71 = vector.load %arg22[%c0_53, %c0_54] : memref<32x64xbf16, #tpu.memory_space<vmem>>, vector<32x64xbf16>
    %cst_55 = arith.constant dense<0.000000e+00> : vector<16x64xf32>
    %72 = tpu.matmul %1, %71, %cst_55 {dimension_numbers = #tpu.dot_dimension_numbers<[1], [0], [0], [1], [0, 0, 1, 1], [], []>} : vector<16x32xbf16>, vector<32x64xbf16>, vector<16x64xf32> -> vector<16x64xf32>
    %73 = arith.addf %70, %72 : vector<16x64xf32>
    %c0_56 = arith.constant 0 : index
    %c0_57 = arith.constant 0 : index
    %74 = vector.load %arg23[%c0_56, %c0_57] : memref<1x64xf32, #tpu.memory_space<vmem>>, vector<1x64xf32>
    %75 = vector.broadcast %74 : vector<1x64xf32> to vector<16x64xf32>
    %76 = arith.addf %73, %75 : vector<16x64xf32>
    %77 = arith.truncf %76 : vector<16x64xf32> to vector<16x64xbf16>
    %c0_58 = arith.constant 0 : index
    %c0_59 = arith.constant 0 : index
    %78 = vector.load %arg24[%c0_58, %c0_59] : memref<64x64xbf16, #tpu.memory_space<vmem>>, vector<64x64xbf16>
    %cst_60 = arith.constant dense<0.000000e+00> : vector<16x64xf32>
    %79 = tpu.matmul %77, %78, %cst_60 {dimension_numbers = #tpu.dot_dimension_numbers<[1], [0], [0], [1], [0, 0, 1, 1], [], []>} : vector<16x64xbf16>, vector<64x64xbf16>, vector<16x64xf32> -> vector<16x64xf32>
    %c0_61 = arith.constant 0 : index
    %c0_62 = arith.constant 0 : index
    %80 = vector.load %arg25[%c0_61, %c0_62] : memref<1x64xf32, #tpu.memory_space<vmem>>, vector<1x64xf32>
    %81 = vector.broadcast %80 : vector<1x64xf32> to vector<16x64xf32>
    %82 = arith.addf %79, %81 : vector<16x64xf32>
    %83 = arith.truncf %82 : vector<16x64xf32> to vector<16x64xbf16>
    %c0_63 = arith.constant 0 : index
    %c0_64 = arith.constant 0 : index
    %84 = vector.load %arg26[%c0_63, %c0_64] : memref<64x64xbf16, #tpu.memory_space<vmem>>, vector<64x64xbf16>
    %cst_65 = arith.constant dense<0.000000e+00> : vector<16x64xf32>
    %85 = tpu.matmul %83, %84, %cst_65 {dimension_numbers = #tpu.dot_dimension_numbers<[1], [0], [0], [1], [0, 0, 1, 1], [], []>} : vector<16x64xbf16>, vector<64x64xbf16>, vector<16x64xf32> -> vector<16x64xf32>
    %c0_66 = arith.constant 0 : index
    %c0_67 = arith.constant 0 : index
    %86 = vector.load %arg27[%c0_66, %c0_67] : memref<1x64xf32, #tpu.memory_space<vmem>>, vector<1x64xf32>
    %87 = vector.broadcast %86 : vector<1x64xf32> to vector<16x64xf32>
    %88 = arith.addf %85, %87 : vector<16x64xf32>
    %c0_68 = arith.constant 0 : index
    %c0_69 = arith.constant 0 : index
    %89 = vector.load %arg28[%c0_68, %c0_69] : memref<32x64xbf16, #tpu.memory_space<vmem>>, vector<32x64xbf16>
    %cst_70 = arith.constant dense<0.000000e+00> : vector<16x64xf32>
    %90 = tpu.matmul %1, %89, %cst_70 {dimension_numbers = #tpu.dot_dimension_numbers<[1], [0], [0], [1], [0, 0, 1, 1], [], []>} : vector<16x32xbf16>, vector<32x64xbf16>, vector<16x64xf32> -> vector<16x64xf32>
    %c0_71 = arith.constant 0 : index
    %c0_72 = arith.constant 0 : index
    %91 = vector.load %arg29[%c0_71, %c0_72] : memref<1x64xf32, #tpu.memory_space<vmem>>, vector<1x64xf32>
    %92 = vector.broadcast %91 : vector<1x64xf32> to vector<16x64xf32>
    %93 = arith.addf %90, %92 : vector<16x64xf32>
    %94 = arith.negf %88 : vector<16x64xf32>
    %95 = math.exp %94 : vector<16x64xf32>
    %cst_73 = arith.constant 1.000000e+00 : f32
    %96 = vector.broadcast %cst_73 : f32 to vector<16x64xf32>
    %97 = arith.addf %96, %95 : vector<16x64xf32>
    %98 = arith.divf %96, %97 : vector<16x64xf32>
    %99 = arith.mulf %98, %93 : vector<16x64xf32>
    %100 = arith.addf %67, %99 : vector<16x64xf32>
    %c0_74 = arith.constant 0 : index
    %c0_75 = arith.constant 0 : index
    %101 = vector.load %arg30[%c0_74, %c0_75] : memref<16x64xf32, #tpu.memory_space<vmem>>, vector<16x64xf32>
    tpu.vector_store %arg30[%c0_74, %c0_75], %100 {strides = array<i32>} : memref<16x64xf32, #tpu.memory_space<vmem>>, vector<16x64xf32>,
    return
  }
  func.func @transform_0(%arg0: i32) -> (i32, i32) {
    %c0_i32 = arith.constant 0 : i32
    %c0_i32_0 = arith.constant 0 : i32
    return %arg0, %c0_i32 : i32, i32
  }
  func.func @transform_1(%arg0: i32) -> (i32, i32) {
    %c0_i32 = arith.constant 0 : i32
    %c0_i32_0 = arith.constant 0 : i32
    return %arg0, %c0_i32 : i32, i32
  }
  func.func @transform_2(%arg0: i32) -> (i32, i32) {
    %c0_i32 = arith.constant 0 : i32
    %c0_i32_0 = arith.constant 0 : i32
    %c0_i32_1 = arith.constant 0 : i32
    return %c0_i32, %c0_i32_0 : i32, i32
  }
  func.func @transform_3(%arg0: i32) -> (i32, i32) {
    %c0_i32 = arith.constant 0 : i32
    %c0_i32_0 = arith.constant 0 : i32
    %c0_i32_1 = arith.constant 0 : i32
    return %c0_i32, %c0_i32_0 : i32, i32
  }
  func.func @transform_4(%arg0: i32) -> (i32, i32) {
    %c0_i32 = arith.constant 0 : i32
    %c0_i32_0 = arith.constant 0 : i32
    %c0_i32_1 = arith.constant 0 : i32
    return %c0_i32, %c0_i32_0 : i32, i32
  }
  func.func @transform_5(%arg0: i32) -> (i32, i32) {
    %c0_i32 = arith.constant 0 : i32
    %c0_i32_0 = arith.constant 0 : i32
    %c0_i32_1 = arith.constant 0 : i32
    return %c0_i32, %c0_i32_0 : i32, i32
  }
  func.func @transform_6(%arg0: i32) -> (i32, i32) {
    %c0_i32 = arith.constant 0 : i32
    %c0_i32_0 = arith.constant 0 : i32
    %c0_i32_1 = arith.constant 0 : i32
    return %c0_i32, %c0_i32_0 : i32, i32
  }
  func.func @transform_7(%arg0: i32) -> (i32, i32) {
    %c0_i32 = arith.constant 0 : i32
    %c0_i32_0 = arith.constant 0 : i32
    %c0_i32_1 = arith.constant 0 : i32
    return %c0_i32, %c0_i32_0 : i32, i32
  }
  func.func @transform_8(%arg0: i32) -> (i32, i32) {
    %c0_i32 = arith.constant 0 : i32
    %c0_i32_0 = arith.constant 0 : i32
    %c0_i32_1 = arith.constant 0 : i32
    return %c0_i32, %c0_i32_0 : i32, i32
  }
  func.func @transform_9(%arg0: i32) -> (i32, i32) {
    %c0_i32 = arith.constant 0 : i32
    %c0_i32_0 = arith.constant 0 : i32
    %c0_i32_1 = arith.constant 0 : i32
    return %c0_i32, %c0_i32_0 : i32, i32
  }
  func.func @transform_10(%arg0: i32) -> (i32, i32) {
    %c0_i32 = arith.constant 0 : i32
    %c0_i32_0 = arith.constant 0 : i32
    %c0_i32_1 = arith.constant 0 : i32
    return %c0_i32, %c0_i32_0 : i32, i32
  }
  func.func @transform_11(%arg0: i32) -> (i32, i32) {
    %c0_i32 = arith.constant 0 : i32
    %c0_i32_0 = arith.constant 0 : i32
    %c0_i32_1 = arith.constant 0 : i32
    return %c0_i32, %c0_i32_0 : i32, i32
  }
  func.func @transform_12(%arg0: i32) -> (i32, i32) {
    %c0_i32 = arith.constant 0 : i32
    %c0_i32_0 = arith.constant 0 : i32
    %c0_i32_1 = arith.constant 0 : i32
    return %c0_i32, %c0_i32_0 : i32, i32
  }
  func.func @transform_13(%arg0: i32) -> (i32, i32) {
    %c0_i32 = arith.constant 0 : i32
    %c0_i32_0 = arith.constant 0 : i32
    %c0_i32_1 = arith.constant 0 : i32
    return %c0_i32, %c0_i32_0 : i32, i32
  }
  func.func @transform_14(%arg0: i32) -> (i32, i32) {
    %c0_i32 = arith.constant 0 : i32
    %c0_i32_0 = arith.constant 0 : i32
    %c0_i32_1 = arith.constant 0 : i32
    return %c0_i32, %c0_i32_0 : i32, i32
  }
  func.func @transform_15(%arg0: i32) -> (i32, i32) {
    %c0_i32 = arith.constant 0 : i32
    %c0_i32_0 = arith.constant 0 : i32
    %c0_i32_1 = arith.constant 0 : i32
    return %c0_i32, %c0_i32_0 : i32, i32
  }
  func.func @transform_16(%arg0: i32) -> (i32, i32) {
    %c0_i32 = arith.constant 0 : i32
    %c0_i32_0 = arith.constant 0 : i32
    %c0_i32_1 = arith.constant 0 : i32
    return %c0_i32, %c0_i32_0 : i32, i32
  }
  func.func @transform_17(%arg0: i32) -> (i32, i32) {
    %c0_i32 = arith.constant 0 : i32
    %c0_i32_0 = arith.constant 0 : i32
    %c0_i32_1 = arith.constant 0 : i32
    return %c0_i32, %c0_i32_0 : i32, i32
  }
  func.func @transform_18(%arg0: i32) -> (i32, i32) {
    %c0_i32 = arith.constant 0 : i32
    %c0_i32_0 = arith.constant 0 : i32
    %c0_i32_1 = arith.constant 0 : i32
    return %c0_i32, %c0_i32_0 : i32, i32
  }
  func.func @transform_19(%arg0: i32) -> (i32, i32) {
    %c0_i32 = arith.constant 0 : i32
    %c0_i32_0 = arith.constant 0 : i32
    %c0_i32_1 = arith.constant 0 : i32
    return %c0_i32, %c0_i32_0 : i32, i32
  }
  func.func @transform_20(%arg0: i32) -> (i32, i32) {
    %c0_i32 = arith.constant 0 : i32
    %c0_i32_0 = arith.constant 0 : i32
    %c0_i32_1 = arith.constant 0 : i32
    return %c0_i32, %c0_i32_0 : i32, i32
  }
  func.func @transform_21(%arg0: i32) -> (i32, i32) {
    %c0_i32 = arith.constant 0 : i32
    %c0_i32_0 = arith.constant 0 : i32
    %c0_i32_1 = arith.constant 0 : i32
    return %c0_i32, %c0_i32_0 : i32, i32
  }
  func.func @transform_22(%arg0: i32) -> (i32, i32) {
    %c0_i32 = arith.constant 0 : i32
    %c0_i32_0 = arith.constant 0 : i32
    %c0_i32_1 = arith.constant 0 : i32
    return %c0_i32, %c0_i32_0 : i32, i32
  }
  func.func @transform_23(%arg0: i32) -> (i32, i32) {
    %c0_i32 = arith.constant 0 : i32
    %c0_i32_0 = arith.constant 0 : i32
    %c0_i32_1 = arith.constant 0 : i32
    return %c0_i32, %c0_i32_0 : i32, i32
  }
  func.func @transform_24(%arg0: i32) -> (i32, i32) {
    %c0_i32 = arith.constant 0 : i32
    %c0_i32_0 = arith.constant 0 : i32
    %c0_i32_1 = arith.constant 0 : i32
    return %c0_i32, %c0_i32_0 : i32, i32
  }
  func.func @transform_25(%arg0: i32) -> (i32, i32) {
    %c0_i32 = arith.constant 0 : i32
    %c0_i32_0 = arith.constant 0 : i32
    %c0_i32_1 = arith.constant 0 : i32
    return %c0_i32, %c0_i32_0 : i32, i32
  }
  func.func @transform_26(%arg0: i32) -> (i32, i32) {
    %c0_i32 = arith.constant 0 : i32
    %c0_i32_0 = arith.constant 0 : i32
    %c0_i32_1 = arith.constant 0 : i32
    return %c0_i32, %c0_i32_0 : i32, i32
  }
  func.func @transform_27(%arg0: i32) -> (i32, i32) {
    %c0_i32 = arith.constant 0 : i32
    %c0_i32_0 = arith.constant 0 : i32
    %c0_i32_1 = arith.constant 0 : i32
    return %c0_i32, %c0_i32_0 : i32, i32
  }
  func.func @transform_28(%arg0: i32) -> (i32, i32) {
    %c0_i32 = arith.constant 0 : i32
    %c0_i32_0 = arith.constant 0 : i32
    %c0_i32_1 = arith.constant 0 : i32
    return %c0_i32, %c0_i32_0 : i32, i32
  }
  func.func @transform_29(%arg0: i32) -> (i32, i32) {
    %c0_i32 = arith.constant 0 : i32
    %c0_i32_0 = arith.constant 0 : i32
    return %arg0, %c0_i32 : i32, i32
  }
}

</mosaic_0001>

<bundles_post_ra>
// kernel: tpu_custom_call.1
= control target key start
LH: loop header
LB: loop body
LE: loop exit
PB: predicated region body
PF: predicated region fallthrough
CT: control target
= control target key end

     0   :  { %s2578_s6 = smov 1   ;;  %s2579_s10 = smov 2   ;;  %s3065_s0 = inlined_call_operand.smem [shape: u32[30], index: -1, kind: input, shape index: {}] }
   0x1   :  { %s2643_s5 = sld [smem:[%s3065_s0]]   ;;  %s2580_s14 = smov 3  }
   0x2   :  { %s2648_s9 = sld [smem:[%s3065_s0 + %s2578_s6]]   ;;  %s2581_s18 = smov 4  }
   0x3   :  { %s2653_s13 = sld [smem:[%s3065_s0 + %s2579_s10]]   ;;  %s2582_s22 = smov 5  }
   0x4   :  { %s2658_s17 = sld [smem:[%s3065_s0 + %s2580_s14]]   ;;  %s2583_s26 = smov 6  }
   0x5   :  { %s2663_s21 = sld [smem:[%s3065_s0 + %s2581_s18]]   ;;  %s2584_s30 = smov 7  }
   0x6   :  { %s2668_s25 = sld [smem:[%s3065_s0 + %s2582_s22]]   ;;  %s2585_s4 = smov 8  }
   0x7   :  { %s2673_s29 = sld [smem:[%s3065_s0 + %s2583_s26]]   ;;  %s2586_s10 = smov 9  }
   0x8   :  { %s2678_s3 = sld [smem:[%s3065_s0 + %s2584_s30]]   ;;  %s2587_s15 = smov 10  }
   0x9   :  { %s2683_s8 = sld [smem:[%s3065_s0 + %s2585_s4]]   ;;  %s2588_s20 = smov 11  }
   0xa   :  { %s2688_s14 = sld [smem:[%s3065_s0 + %s2586_s10]]   ;;  %s2589_s26 = smov 12  }
   0xb   :  { %s2693_s19 = sld [smem:[%s3065_s0 + %s2587_s15]]   ;;  %s2590_s1 = smov 13  }
   0xc   :  { %s2698_s24 = sld [smem:[%s3065_s0 + %s2588_s20]]   ;;  %s2591_s7 = smov 14  }
   0xd   :  { %s2703_s30 = sld [smem:[%s3065_s0 + %s2589_s26]]   ;;  %s2592_s15 = smov 15  }
   0xe   :  { %s2708_s6 = sld [smem:[%s3065_s0 + %s2590_s1]]   ;;  %s2593_s22 = smov 16  }
   0xf   :  { %3075 = sst [smem:[#allocation48_spill]] %s2683_s8  ;;  %s2594_s28 = smov 17  }
  0x10   :  { %s2713_s12 = sld [smem:[%s3065_s0 + %s2591_s7]]   ;;  %s2595_s7 = smov 18  }
  0x11   :  { %3076 = sst [smem:[#allocation49_spill]] %s2693_s19 }
  0x12   :  { %3077 = sst [smem:[#allocation50_spill]] %s2698_s24 }
  0x13   :  { %s2718_s20 = sld [smem:[%s3065_s0 + %s2592_s15]]   ;;  %s2596_s15 = smov 19  }
  0x14   :  { %3078 = sst [smem:[#allocation51_spill]] %s2708_s6 }
  0x15   :  { %s2723_s27 = sld [smem:[%s3065_s0 + %s2593_s22]]   ;;  %s2597_s22 = smov 20  }
  0x16   :  { %s2728_s4 = sld [smem:[%s3065_s0 + %s2594_s28]]   ;;  %s2598_s28 = smov 21  }
  0x17   :  { %s2733_s24 = sld [smem:[%s3065_s0 + %s2595_s7]]   ;;  %s2599_s7 = smov 22  }
  0x18   :  { %s2743_s6 = sld [smem:[%s3065_s0 + %s2597_s22]]   ;;  %s2601_s22 = smov 24  }
  0x19   :  { %3079 = sst [smem:[#allocation52_spill]] %s2718_s20 }
  0x1a   :  { %s2738_s20 = sld [smem:[%s3065_s0 + %s2596_s15]]   ;;  %s2600_s15 = smov 23  }
  0x1b   :  { %s2753_s19 = sld [smem:[%s3065_s0 + %s2599_s7]]   ;;  %s2603_s7 = smov 26  }
  0x1c   :  { %3080 = sst [smem:[#allocation53_spill]] %s2728_s4 }
  0x1d   :  { %s2748_s4 = sld [smem:[%s3065_s0 + %s2598_s28]]   ;;  %s2602_s28 = smov 25  }
  0x1e   :  { %3082 = sst [smem:[#allocation55_spill]] %s2743_s6 }
  0x1f   :  { %s2763_s6 = sld [smem:[%s3065_s0 + %s2601_s22]]   ;;  %s2605_s22 = smov 28  }
  0x20   :  { %3081 = sst [smem:[#allocation54_spill]] %s2738_s20 }
  0x21   :  { %3084 = sst [smem:[#allocation57_spill]] %s2753_s19 }
  0x22   :  { %s2758_s20 = sld [smem:[%s3065_s0 + %s2600_s15]]   ;;  %s2604_s15 = smov 27  }
  0x23   :  { %3083 = sst [smem:[#allocation56_spill]] %s2748_s4 }
  0x24   :  { %s2768_s4 = sld [smem:[%s3065_s0 + %s2602_s28]]   ;;  %s2606_s28 = smov 29  }
  0x25   :  { %3085 = sst [smem:[#allocation58_spill]] %s2763_s6 }
  0x26   :  { %s2773_s19 = sld [smem:[%s3065_s0 + %s2603_s7]]  }
  0x27   :  { %s2778_s8 = sld [smem:[%s3065_s0 + %s2604_s15]]  }
  0x28   :  { %s2783_s6 = sld [smem:[%s3065_s0 + %s2605_s22]]  }
  0x2a   :  { %3086 = sst [smem:[#allocation59_spill]] %s2768_s4 }
  0x2b   :  { %s2788_s4 = sld [smem:[%s3065_s0 + %s2606_s28]]  }
  0x2c   :  { %64 = vsyncpa [#allocation3], 0 }
  0x2d   :  { %65 = vsyncpa [#allocation6], 0 }
  0x2e   :  { %66 = vsyncpa [#allocation9], 0 }
  0x2f   :  { %67 = vsyncpa [#allocation12], 0 }
  0x30   :  { %68 = vsyncpa [#allocation15], 0 }
  0x31   :  { %69 = vsyncpa [#allocation18], 0 }
  0x32   :  { %70 = vsyncpa [#allocation21], 0 }
  0x33   :  { %71 = vsyncpa [#allocation24], 0 }
  0x34   :  { %72 = vsyncpa [#allocation27], 0 }
  0x35   :  { %73 = vsyncpa [#allocation30], 0 }
  0x36   :  { %74 = vsyncpa [#allocation33], 0 }
  0x37   :  { %75 = vsyncpa [#allocation4], 0  ;;  %s2607_s7 = smov [#allocation5]   ;;  %s2070_s0 = scalar_lea.hbm %s2648_s9, 128 }
  0x38   :  { %s93_s10 = sshll.u32 %s2607_s7, 4  ;;  %p2071_p0 = scmp.ne.s32.totalorder %s2648_s9, %s2070_s0  ;;  %s94_s10 = int_to_ptr.vmem [resolvable:$true] %s93_s10 }
  0x39   :  { %p2074_p1 = scmp.lt.u32.totalorder %s2070_s0, %s2648_s9 }
  0x3b   :  { %p2076_p2 = pnand %p2074_p1, %p2071_p0 }
  0x3d   :  { %2079 = shalt.err (!%p2076_p2)
}
  0x3e   :  { %s2080_s11 = scalar_lea.vmem %s94_s10, 128  ;;  %p2085_p4 = scmp.lt.s32.totalorder %s94_s10, %s94_s10 }
  0x3f   :  { %p2081_p3 = scmp.ne.s32.totalorder %s94_s10, %s2080_s11  ;;  %p2086_p5 = scmp.lt.s32.totalorder %s2080_s11, %s2080_s11 }
  0x41   :  { %p2087_p6 = por %p2086_p5, %p2085_p4 }
  0x43   :  { %p2088_p7 = pnand %p2087_p6, %p2081_p3 }
  0x45   :  { %2091 = shalt.err (!%p2088_p7)
}
  0x46   :  { %s2608_s15 = smov 64   ;;  %s2609_s16 = smov 4  }
  0x47   :  { %99 = dma.hbm_to_vmem [thread:$0]  %s2648_s9, 128, %s94_s10, [#allocation6], %s2608_s15, %s2608_s15, %s2609_s16  }
  0x48   :  { %s2610_s18 = smov [#allocation8]   ;;  %s2611_s23 = smov [#allocation11]  }
  0x49   :  { %s117_s22 = sshll.u32 %s2610_s18, 4  ;;  %s139_s26 = sshll.u32 %s2611_s23, 4  ;;  %s118_s22 = int_to_ptr.vmem [resolvable:$true] %s117_s22  ;;  %s140_s26 = int_to_ptr.vmem [resolvable:$true] %s139_s26 }
  0x4a   :  { %s2092_s28 = scalar_lea.hbm %s2658_s17, 256 }
  0x4b   :  { %p2093_p8 = scmp.ne.s32.totalorder %s2658_s17, %s2092_s28  ;;  %p2096_p9 = scmp.lt.u32.totalorder %s2092_s28, %s2658_s17 }
  0x4d   :  { %p2098_p10 = pnand %p2096_p9, %p2093_p8 }
  0x4f   :  { %2101 = shalt.err (!%p2098_p10)
}
  0x50   :  { %s2102_s1 = scalar_lea.vmem %s118_s22, 256  ;;  %p2107_p12 = scmp.lt.s32.totalorder %s118_s22, %s118_s22 }
  0x51   :  { %p2103_p11 = scmp.ne.s32.totalorder %s118_s22, %s2102_s1  ;;  %p2108_p13 = scmp.lt.s32.totalorder %s2102_s1, %s2102_s1 }
  0x53   :  { %p2109_p0 = por %p2108_p13, %p2107_p12 }
  0x55   :  { %p2110_p1 = pnand %p2109_p0, %p2103_p11 }
  0x57   :  { %2113 = shalt.err (!%p2110_p1)
}
  0x58   :  { %123 = dma.hbm_to_vmem [thread:$0]  %s2658_s17, 256, %s118_s22, [#allocation9], %s2608_s15, %s2608_s15, %s2609_s16  }
  0x59   :  { %s2114_s9 = scalar_lea.hbm %s2668_s25, 512 }
  0x5a   :  { %p2115_p2 = scmp.ne.s32.totalorder %s2668_s25, %s2114_s9  ;;  %p2118_p3 = scmp.lt.u32.totalorder %s2114_s9, %s2668_s25 }
  0x5c   :  { %p2120_p4 = pnand %p2118_p3, %p2115_p2 }
  0x5e   :  { %2123 = shalt.err (!%p2120_p4)
}
  0x5f   :  { %s2124_s2 = scalar_lea.vmem %s140_s26, 512  ;;  %p2129_p6 = scmp.lt.s32.totalorder %s140_s26, %s140_s26 }
  0x60   :  { %p2125_p5 = scmp.ne.s32.totalorder %s140_s26, %s2124_s2  ;;  %p2130_p7 = scmp.lt.s32.totalorder %s2124_s2, %s2124_s2 }
  0x62   :  { %p2131_p8 = por %p2130_p7, %p2129_p6 }
  0x64   :  { %p2132_p9 = pnand %p2131_p8, %p2125_p5 }
  0x66   :  { %2135 = shalt.err (!%p2132_p9)
}
  0x67   :  { %145 = dma.hbm_to_vmem [thread:$0]  %s2668_s25, 512, %s140_s26, [#allocation12], %s2608_s15, %s2608_s15, %s2609_s16  }
  0x68   :  { %s2612_s17 = smov [#allocation14]   ;;  %s2613_s10 = smov [#allocation17]  }
  0x69   :  { %s161_s7 = sshll.u32 %s2612_s17, 4  ;;  %s183_s0 = sshll.u32 %s2613_s10, 4  ;;  %s162_s7 = int_to_ptr.vmem [resolvable:$true] %s161_s7  ;;  %s184_s0 = int_to_ptr.vmem [resolvable:$true] %s183_s0 }
  0x6a   :  { %s2136_s11 = scalar_lea.hbm %s2678_s3, 512 }
  0x6b   :  { %p2137_p10 = scmp.ne.s32.totalorder %s2678_s3, %s2136_s11  ;;  %p2140_p11 = scmp.lt.u32.totalorder %s2136_s11, %s2678_s3 }
  0x6d   :  { %p2142_p12 = pnand %p2140_p11, %p2137_p10 }
  0x6f   :  { %2145 = shalt.err (!%p2142_p12)
}
  0x70   :  { %s2146_s18 = scalar_lea.vmem %s162_s7, 512  ;;  %p2151_p0 = scmp.lt.s32.totalorder %s162_s7, %s162_s7 }
  0x71   :  { %p2147_p13 = scmp.ne.s32.totalorder %s162_s7, %s2146_s18  ;;  %p2152_p1 = scmp.lt.s32.totalorder %s2146_s18, %s2146_s18 }
  0x73   :  { %p2153_p2 = por %p2152_p1, %p2151_p0 }
  0x75   :  { %p2154_p3 = pnand %p2153_p2, %p2147_p13 }
  0x77   :  { %2157 = shalt.err (!%p2154_p3)
}
  0x78   :  { %167 = dma.hbm_to_vmem [thread:$0]  %s2678_s3, 512, %s162_s7, [#allocation15], %s2608_s15, %s2608_s15, %s2609_s16  }
  0x79   :  { %s2158_s25 = scalar_lea.hbm %s2688_s14, 256 }
  0x7a   :  { %p2159_p4 = scmp.ne.s32.totalorder %s2688_s14, %s2158_s25  ;;  %p2162_p5 = scmp.lt.u32.totalorder %s2158_s25, %s2688_s14 }
  0x7c   :  { %p2164_p6 = pnand %p2162_p5, %p2159_p4 }
  0x7e   :  { %2167 = shalt.err (!%p2164_p6)
}
  0x7f   :  { %s2168_s22 = scalar_lea.vmem %s184_s0, 256  ;;  %p2173_p8 = scmp.lt.s32.totalorder %s184_s0, %s184_s0 }
  0x80   :  { %p2169_p7 = scmp.ne.s32.totalorder %s184_s0, %s2168_s22  ;;  %p2174_p9 = scmp.lt.s32.totalorder %s2168_s22, %s2168_s22 }
  0x82   :  { %p2175_p10 = por %p2174_p9, %p2173_p8 }
  0x84   :  { %p2176_p11 = pnand %p2175_p10, %p2169_p7 }
  0x86   :  { %2179 = shalt.err (!%p2176_p11)
}
  0x87   :  { %189 = dma.hbm_to_vmem [thread:$0]  %s2688_s14, 256, %s184_s0, [#allocation18], %s2608_s15, %s2608_s15, %s2609_s16  }
  0x88   :  { %s2614_s3 = smov [#allocation20]   ;;  %s2615_s26 = smov [#allocation23]  }
  0x89   :  { %s207_s23 = sshll.u32 %s2614_s3, 4  ;;  %s229_s28 = sshll.u32 %s2615_s26, 4  ;;  %s208_s23 = int_to_ptr.vmem [resolvable:$true] %s207_s23  ;;  %s230_s28 = int_to_ptr.vmem [resolvable:$true] %s229_s28 }
  0x8a   :  { %s2180_s1 = scalar_lea.hbm %s2703_s30, 256 }
  0x8b   :  { %p2181_p12 = scmp.ne.s32.totalorder %s2703_s30, %s2180_s1  ;;  %p2184_p13 = scmp.lt.u32.totalorder %s2180_s1, %s2703_s30 }
  0x8d   :  { %p2186_p0 = pnand %p2184_p13, %p2181_p12 }
  0x8f   :  { %2189 = shalt.err (!%p2186_p0)
}
  0x90   :  { %s2190_s9 = scalar_lea.vmem %s208_s23, 256  ;;  %p2195_p2 = scmp.lt.s32.totalorder %s208_s23, %s208_s23 }
  0x91   :  { %p2191_p1 = scmp.ne.s32.totalorder %s208_s23, %s2190_s9  ;;  %p2196_p3 = scmp.lt.s32.totalorder %s2190_s9, %s2190_s9 }
  0x93   :  { %p2197_p4 = por %p2196_p3, %p2195_p2 }
  0x95   :  { %p2198_p5 = pnand %p2197_p4, %p2191_p1 }
  0x97   :  { %2201 = shalt.err (!%p2198_p5)
}
  0x98   :  { %213 = dma.hbm_to_vmem [thread:$0]  %s2703_s30, 256, %s208_s23, [#allocation21], %s2608_s15, %s2608_s15, %s2609_s16  }
  0x99   :  { %s2202_s14 = scalar_lea.hbm %s2713_s12, 512 }
  0x9a   :  { %p2203_p6 = scmp.ne.s32.totalorder %s2713_s12, %s2202_s14  ;;  %p2206_p7 = scmp.lt.u32.totalorder %s2202_s14, %s2713_s12 }
  0x9c   :  { %p2208_p8 = pnand %p2206_p7, %p2203_p6 }
  0x9e   :  { %2211 = shalt.err (!%p2208_p8)
}
  0x9f   :  { %s2212_s2 = scalar_lea.vmem %s230_s28, 512  ;;  %p2217_p10 = scmp.lt.s32.totalorder %s230_s28, %s230_s28 }
  0xa0   :  { %p2213_p9 = scmp.ne.s32.totalorder %s230_s28, %s2212_s2  ;;  %p2218_p11 = scmp.lt.s32.totalorder %s2212_s2, %s2212_s2 }
  0xa2   :  { %p2219_p12 = por %p2218_p11, %p2217_p10 }
  0xa4   :  { %p2220_p13 = pnand %p2219_p12, %p2213_p9 }
  0xa6   :  { %2223 = shalt.err (!%p2220_p13)
}
  0xa7   :  { %235 = dma.hbm_to_vmem [thread:$0]  %s2713_s12, 512, %s230_s28, [#allocation24], %s2608_s15, %s2608_s15, %s2609_s16  }
  0xa8   :  { %s2616_s30 = smov [#allocation26]   ;;  %s2617_s7 = smov [#allocation29]  }
  0xa9   :  { %s251_s17 = sshll.u32 %s2616_s30, 4  ;;  %s273_s10 = sshll.u32 %s2617_s7, 4  ;;  %s252_s17 = int_to_ptr.vmem [resolvable:$true] %s251_s17  ;;  %s274_s10 = int_to_ptr.vmem [resolvable:$true] %s273_s10 }
  0xaa   :  { %s2224_s0 = scalar_lea.hbm %s2723_s27, 512 }
  0xab   :  { %p2225_p0 = scmp.ne.s32.totalorder %s2723_s27, %s2224_s0  ;;  %p2228_p1 = scmp.lt.u32.totalorder %s2224_s0, %s2723_s27 }
  0xad   :  { %p2230_p2 = pnand %p2228_p1, %p2225_p0 }
  0xaf   :  { %2233 = shalt.err (!%p2230_p2)
}
  0xb0   :  { %s2234_s11 = scalar_lea.vmem %s252_s17, 512  ;;  %p2239_p4 = scmp.lt.s32.totalorder %s252_s17, %s252_s17 }
  0xb1   :  { %p2235_p3 = scmp.ne.s32.totalorder %s252_s17, %s2234_s11  ;;  %p2240_p5 = scmp.lt.s32.totalorder %s2234_s11, %s2234_s11 }
  0xb3   :  { %p2241_p6 = por %p2240_p5, %p2239_p4 }
  0xb5   :  { %p2242_p7 = pnand %p2241_p6, %p2235_p3 }
  0xb7   :  { %2245 = shalt.err (!%p2242_p7)
}
  0xb8   :  { %257 = dma.hbm_to_vmem [thread:$0]  %s2723_s27, 512, %s252_s17, [#allocation27], %s2608_s15, %s2608_s15, %s2609_s16  }
  0xb9   :  { %s2246_s12 = scalar_lea.hbm %s2733_s24, 256 }
  0xba   :  { %p2247_p8 = scmp.ne.s32.totalorder %s2733_s24, %s2246_s12  ;;  %p2250_p9 = scmp.lt.u32.totalorder %s2246_s12, %s2733_s24 }
  0xbc   :  { %p2252_p10 = pnand %p2250_p9, %p2247_p8 }
  0xbe   :  { %2255 = shalt.err (!%p2252_p10)
}
  0xbf   :  { %s2256_s18 = scalar_lea.vmem %s274_s10, 256  ;;  %p2261_p12 = scmp.lt.s32.totalorder %s274_s10, %s274_s10 }
  0xc0   :  { %p2257_p11 = scmp.ne.s32.totalorder %s274_s10, %s2256_s18  ;;  %p2262_p13 = scmp.lt.s32.totalorder %s2256_s18, %s2256_s18 }
  0xc2   :  { %p2263_p0 = por %p2262_p13, %p2261_p12 }
  0xc4   :  { %p2264_p1 = pnand %p2263_p0, %p2257_p11 }
  0xc6   :  { %2267 = shalt.err (!%p2264_p1)
}
  0xc7   :  { %279 = dma.hbm_to_vmem [thread:$0]  %s2733_s24, 256, %s274_s10, [#allocation30], %s2608_s15, %s2608_s15, %s2609_s16  }
  0xc8   :  { %s2618_s27 = smov [#allocation32]   ;;  %s2619_s22 = smov [#allocation2]  }
  0xc9   :  { %s303_s25 = sshll.u32 %s2618_s27, 4  ;;  %s81_s3 = sshll.u32 %s2619_s22, 4  ;;  %s304_s25 = int_to_ptr.vmem [resolvable:$true] %s303_s25  ;;  %s82_s3 = int_to_ptr.vmem [resolvable:$true] %s81_s3 }
  0xca   :  { %s2268_s23 = scalar_lea.hbm %s2758_s20, 512 }
  0xcb   :  { %p2269_p2 = scmp.ne.s32.totalorder %s2758_s20, %s2268_s23  ;;  %p2272_p3 = scmp.lt.u32.totalorder %s2268_s23, %s2758_s20 }
  0xcd   :  { %p2274_p4 = pnand %p2272_p3, %p2269_p2 }
  0xcf   :  { %2277 = shalt.err (!%p2274_p4)
}
  0xd0   :  { %s2278_s26 = scalar_lea.vmem %s304_s25, 512  ;;  %p2283_p6 = scmp.lt.s32.totalorder %s304_s25, %s304_s25 }
  0xd1   :  { %p2279_p5 = scmp.ne.s32.totalorder %s304_s25, %s2278_s26  ;;  %p2284_p7 = scmp.lt.s32.totalorder %s2278_s26, %s2278_s26 }
  0xd3   :  { %p2285_p8 = por %p2284_p7, %p2283_p6 }
  0xd5   :  { %p2286_p9 = pnand %p2285_p8, %p2279_p5 }
  0xd7   :  { %2289 = shalt.err (!%p2286_p9)
}
  0xd8   :  { %309 = dma.hbm_to_vmem [thread:$0]  %s2758_s20, 512, %s304_s25, [#allocation33], %s2608_s15, %s2608_s15, %s2609_s16  }
  0xd9   :  { %s2290_s24 = scalar_lea.hbm %s2643_s5, 256 }
  0xda   :  { %p2291_p10 = scmp.ne.s32.totalorder %s2643_s5, %s2290_s24  ;;  %p2294_p11 = scmp.lt.u32.totalorder %s2290_s24, %s2643_s5 }
  0xdc   :  { %p2296_p12 = pnand %p2294_p11, %p2291_p10 }
  0xde   :  { %2299 = shalt.err (!%p2296_p12)
}
  0xdf   :  { %s2300_s28 = scalar_lea.vmem %s82_s3, 256  ;;  %p2305_p0 = scmp.lt.s32.totalorder %s82_s3, %s82_s3 }
  0xe0   :  { %p2301_p13 = scmp.ne.s32.totalorder %s82_s3, %s2300_s28  ;;  %p2306_p1 = scmp.lt.s32.totalorder %s2300_s28, %s2300_s28 }
  0xe2   :  { %p2307_p2 = por %p2306_p1, %p2305_p0 }
  0xe4   :  { %p2308_p3 = pnand %p2307_p2, %p2301_p13 }
  0xe6   :  { %2311 = shalt.err (!%p2308_p3)
}
  0xe7   :  { %s2620_s1 = smov 128   ;;  %s2621_s9 = smov 8  }
  0xe8   :  { %87 = dma.hbm_to_vmem [thread:$0]  %s2643_s5, 256, %s82_s3, [#allocation3], %s2620_s1, %s2620_s1, %s2621_s9  }
  0xe9   :  { %s2622_s20 = smov [#allocation7]   ;;  %s2623_s2 = smov [#allocation10]  }
  0xea   :  { %s105_s14 = sshll.u32 %s2622_s20, 4  ;;  %s130_s30 = sshll.u32 %s2623_s2, 4  ;;  %s106_s14 = int_to_ptr.vmem [resolvable:$true] %s105_s14  ;;  %s131_s30 = int_to_ptr.vmem [resolvable:$true] %s130_s30 }
  0xeb   :  { %s2312_s17 = scalar_lea.hbm %s2653_s13, 512 }
  0xec   :  { %p2313_p4 = scmp.ne.s32.totalorder %s2653_s13, %s2312_s17  ;;  %p2316_p5 = scmp.lt.u32.totalorder %s2312_s17, %s2653_s13 }
  0xee   :  { %p2318_p6 = pnand %p2316_p5, %p2313_p4 }
  0xf0   :  { %2321 = shalt.err (!%p2318_p6)
}
  0xf1   :  { %s2322_s7 = scalar_lea.vmem %s106_s14, 512  ;;  %p2327_p8 = scmp.lt.s32.totalorder %s106_s14, %s106_s14 }
  0xf2   :  { %p2323_p7 = scmp.ne.s32.totalorder %s106_s14, %s2322_s7  ;;  %p2328_p9 = scmp.lt.s32.totalorder %s2322_s7, %s2322_s7 }
  0xf4   :  { %p2329_p10 = por %p2328_p9, %p2327_p8 }
  0xf6   :  { %p2330_p11 = pnand %p2329_p10, %p2323_p7 }
  0xf8   :  { %2333 = shalt.err (!%p2330_p11)
}
  0xf9   :  { %111 = dma.hbm_to_vmem [thread:$0]  %s2653_s13, 512, %s106_s14, [#allocation6], %s2608_s15, %s2608_s15, %s2609_s16  }
  0xfa   :  { %s2334_s5 = scalar_lea.hbm %s2663_s21, 16 }
  0xfb   :  { %p2335_p12 = scmp.ne.s32.totalorder %s2663_s21, %s2334_s5  ;;  %p2338_p13 = scmp.lt.u32.totalorder %s2334_s5, %s2663_s21 }
  0xfd   :  { %p2340_p0 = pnand %p2338_p13, %p2335_p12 }
  0xff   :  { %2343 = shalt.err (!%p2340_p0)
}
 0x100   :  { %s2344_s10 = scalar_lea.vmem %s131_s30, 16  ;;  %s2348_s0 = scalar_lea.vmem %s131_s30, 32 }
 0x101   :  { %p2345_p1 = scmp.ne.s32.totalorder %s131_s30, %s2344_s10  ;;  %p2349_p2 = scmp.lt.s32.totalorder %s131_s30, %s131_s30 }
 0x102   :  { %p2350_p3 = scmp.lt.s32.totalorder %s2348_s0, %s2344_s10 }
 0x104   :  { %p2351_p4 = por %p2350_p3, %p2349_p2 }
 0x106   :  { %p2352_p5 = pnand %p2351_p4, %p2345_p1 }
 0x108   :  { %2355 = shalt.err (!%p2352_p5)
}
 0x109   :  { %133 = dma.hbm_to_vmem [thread:$0]  %s2663_s21, 16, %s131_s30, [#allocation9]  }
 0x10a   :  { %s2624_s13 = smov [#allocation13]   ;;  %s2625_s12 = smov [#allocation16]  }
 0x10b   :  { %s152_s11 = sshll.u32 %s2624_s13, 4  ;;  %s174_s18 = sshll.u32 %s2625_s12, 4  ;;  %s153_s11 = int_to_ptr.vmem [resolvable:$true] %s152_s11  ;;  %s175_s18 = int_to_ptr.vmem [resolvable:$true] %s174_s18 }
 0x10c   :  { %s2356_s27 = scalar_lea.hbm %s2673_s29, 16 }
 0x10d   :  { %p2357_p6 = scmp.ne.s32.totalorder %s2673_s29, %s2356_s27  ;;  %p2360_p7 = scmp.lt.u32.totalorder %s2356_s27, %s2673_s29 }
 0x10f   :  { %p2362_p8 = pnand %p2360_p7, %p2357_p6 }
 0x111   :  { %2365 = shalt.err (!%p2362_p8)
}
 0x112   :  { %s2366_s25 = scalar_lea.vmem %s153_s11, 16  ;;  %s2370_s22 = scalar_lea.vmem %s153_s11, 32 }
 0x113   :  { %p2367_p9 = scmp.ne.s32.totalorder %s153_s11, %s2366_s25  ;;  %p2371_p10 = scmp.lt.s32.totalorder %s153_s11, %s153_s11 }
 0x114   :  { %p2372_p11 = scmp.lt.s32.totalorder %s2370_s22, %s2366_s25 }
 0x116   :  { %p2373_p12 = por %p2372_p11, %p2371_p10 }
 0x118   :  { %p2374_p13 = pnand %p2373_p12, %p2367_p9 }
 0x11a   :  { %2377 = shalt.err (!%p2374_p13)
}
 0x11b   :  { %s3087_s21 = sld [smem:[#allocation48_spill]] }
 0x11c   :  { %155 = dma.hbm_to_vmem [thread:$0]  %s2673_s29, 16, %s153_s11, [#allocation12]  }
 0x121   :  { %s2378_s3 = scalar_lea.hbm %s3087_s21, 16 }
 0x122   :  { %p2379_p0 = scmp.ne.s32.totalorder %s3087_s21, %s2378_s3  ;;  %p2382_p1 = scmp.lt.u32.totalorder %s2378_s3, %s3087_s21 }
 0x124   :  { %p2384_p2 = pnand %p2382_p1, %p2379_p0 }
 0x126   :  { %2387 = shalt.err (!%p2384_p2)
}
 0x127   :  { %s2388_s23 = scalar_lea.vmem %s175_s18, 16  ;;  %s2392_s26 = scalar_lea.vmem %s175_s18, 32 }
 0x128   :  { %p2389_p3 = scmp.ne.s32.totalorder %s175_s18, %s2388_s23  ;;  %p2393_p4 = scmp.lt.s32.totalorder %s175_s18, %s175_s18 }
 0x129   :  { %p2394_p5 = scmp.lt.s32.totalorder %s2392_s26, %s2388_s23 }
 0x12b   :  { %p2395_p6 = por %p2394_p5, %p2393_p4 }
 0x12d   :  { %p2396_p7 = pnand %p2395_p6, %p2389_p3 }
 0x12f   :  { %2399 = shalt.err (!%p2396_p7)
}
 0x130   :  { %s3088_s24 = sld [smem:[#allocation49_spill]]  ;;  %s2626_s29 = smov [#allocation19]  }
 0x131   :  { %177 = dma.hbm_to_vmem [thread:$0]  %s3087_s21, 16, %s175_s18, [#allocation15]  }
 0x132   :  { %s196_s28 = sshll.u32 %s2626_s29, 4  ;;  %s2627_s20 = smov [#allocation22]   ;;  %s197_s28 = int_to_ptr.vmem [resolvable:$true] %s196_s28 }
 0x133   :  { %s220_s14 = sshll.u32 %s2627_s20, 4  ;;  %s221_s14 = int_to_ptr.vmem [resolvable:$true] %s220_s14 }
 0x136   :  { %s2400_s2 = scalar_lea.hbm %s3088_s24, 16 }
 0x137   :  { %p2401_p8 = scmp.ne.s32.totalorder %s3088_s24, %s2400_s2  ;;  %p2404_p9 = scmp.lt.u32.totalorder %s2400_s2, %s3088_s24 }
 0x139   :  { %p2406_p10 = pnand %p2404_p9, %p2401_p8 }
 0x13b   :  { %2409 = shalt.err (!%p2406_p10)
}
 0x13c   :  { %s2410_s30 = scalar_lea.vmem %s197_s28, 16  ;;  %s2414_s17 = scalar_lea.vmem %s197_s28, 32 }
 0x13d   :  { %p2411_p11 = scmp.ne.s32.totalorder %s197_s28, %s2410_s30  ;;  %p2415_p12 = scmp.lt.s32.totalorder %s197_s28, %s197_s28 }
 0x13e   :  { %p2416_p13 = scmp.lt.s32.totalorder %s2414_s17, %s2410_s30 }
 0x140   :  { %p2417_p0 = por %p2416_p13, %p2415_p12 }
 0x142   :  { %p2418_p1 = pnand %p2417_p0, %p2411_p11 }
 0x144   :  { %2421 = shalt.err (!%p2418_p1)
}
 0x145   :  { %s3089_s7 = sld [smem:[#allocation51_spill]] }
 0x146   :  { %199 = dma.hbm_to_vmem [thread:$0]  %s3088_s24, 16, %s197_s28, [#allocation18]  }
 0x14b   :  { %s2422_s5 = scalar_lea.hbm %s3089_s7, 16 }
 0x14c   :  { %p2423_p2 = scmp.ne.s32.totalorder %s3089_s7, %s2422_s5  ;;  %p2426_p3 = scmp.lt.u32.totalorder %s2422_s5, %s3089_s7 }
 0x14e   :  { %p2428_p4 = pnand %p2426_p3, %p2423_p2 }
 0x150   :  { %2431 = shalt.err (!%p2428_p4)
}
 0x151   :  { %s2432_s10 = scalar_lea.vmem %s221_s14, 16  ;;  %s2436_s0 = scalar_lea.vmem %s221_s14, 32 }
 0x152   :  { %p2433_p5 = scmp.ne.s32.totalorder %s221_s14, %s2432_s10  ;;  %p2437_p6 = scmp.lt.s32.totalorder %s221_s14, %s221_s14 }
 0x153   :  { %p2438_p7 = scmp.lt.s32.totalorder %s2436_s0, %s2432_s10 }
 0x155   :  { %p2439_p8 = por %p2438_p7, %p2437_p6 }
 0x157   :  { %p2440_p9 = pnand %p2439_p8, %p2433_p5 }
 0x159   :  { %2443 = shalt.err (!%p2440_p9)
}
 0x15a   :  { %s3090_s13 = sld [smem:[#allocation52_spill]]  ;;  %s2628_s11 = smov [#allocation25]  }
 0x15b   :  { %223 = dma.hbm_to_vmem [thread:$0]  %s3089_s7, 16, %s221_s14, [#allocation21]  }
 0x15c   :  { %s242_s12 = sshll.u32 %s2628_s11, 4  ;;  %s2629_s18 = smov [#allocation28]   ;;  %s243_s12 = int_to_ptr.vmem [resolvable:$true] %s242_s12 }
 0x15d   :  { %s264_s27 = sshll.u32 %s2629_s18, 4  ;;  %s265_s27 = int_to_ptr.vmem [resolvable:$true] %s264_s27 }
 0x160   :  { %s2444_s25 = scalar_lea.hbm %s3090_s13, 16 }
 0x161   :  { %p2445_p10 = scmp.ne.s32.totalorder %s3090_s13, %s2444_s25  ;;  %p2448_p11 = scmp.lt.u32.totalorder %s2444_s25, %s3090_s13 }
 0x163   :  { %p2450_p12 = pnand %p2448_p11, %p2445_p10 }
 0x165   :  { %2453 = shalt.err (!%p2450_p12)
}
 0x166   :  { %s2454_s22 = scalar_lea.vmem %s243_s12, 16  ;;  %s2458_s21 = scalar_lea.vmem %s243_s12, 32 }
 0x167   :  { %p2455_p13 = scmp.ne.s32.totalorder %s243_s12, %s2454_s22  ;;  %p2459_p0 = scmp.lt.s32.totalorder %s243_s12, %s243_s12 }
 0x168   :  { %p2460_p1 = scmp.lt.s32.totalorder %s2458_s21, %s2454_s22 }
 0x16a   :  { %p2461_p2 = por %p2460_p1, %p2459_p0 }
 0x16c   :  { %p2462_p3 = pnand %p2461_p2, %p2455_p13 }
 0x16e   :  { %2465 = shalt.err (!%p2462_p3)
}
 0x16f   :  { %s3091_s3 = sld [smem:[#allocation53_spill]] }
 0x170   :  { %245 = dma.hbm_to_vmem [thread:$0]  %s3090_s13, 16, %s243_s12, [#allocation24]  }
 0x175   :  { %s2466_s23 = scalar_lea.hbm %s3091_s3, 16 }
 0x176   :  { %p2467_p4 = scmp.ne.s32.totalorder %s3091_s3, %s2466_s23  ;;  %p2470_p5 = scmp.lt.u32.totalorder %s2466_s23, %s3091_s3 }
 0x178   :  { %p2472_p6 = pnand %p2470_p5, %p2467_p4 }
 0x17a   :  { %2475 = shalt.err (!%p2472_p6)
}
 0x17b   :  { %s2476_s26 = scalar_lea.vmem %s265_s27, 16  ;;  %s2480_s24 = scalar_lea.vmem %s265_s27, 32 }
 0x17c   :  { %p2477_p7 = scmp.ne.s32.totalorder %s265_s27, %s2476_s26  ;;  %p2481_p8 = scmp.lt.s32.totalorder %s265_s27, %s265_s27 }
 0x17d   :  { %p2482_p9 = scmp.lt.s32.totalorder %s2480_s24, %s2476_s26 }
 0x17f   :  { %p2483_p10 = por %p2482_p9, %p2481_p8 }
 0x181   :  { %p2484_p11 = pnand %p2483_p10, %p2477_p7 }
 0x183   :  { %2487 = shalt.err (!%p2484_p11)
}
 0x184   :  { %s3092_s29 = sld [smem:[#allocation56_spill]]  ;;  %s2630_s28 = smov [#allocation31]  }
 0x185   :  { %267 = dma.hbm_to_vmem [thread:$0]  %s3091_s3, 16, %s265_s27, [#allocation27]  }
 0x186   :  { %s289_s20 = sshll.u32 %s2630_s28, 4  ;;  %s2631_s14 = smov [#allocation34]   ;;  %s290_s20 = int_to_ptr.vmem [resolvable:$true] %s289_s20 }
 0x187   :  { %s317_s2 = sshll.u32 %s2631_s14, 4  ;;  %s318_s2 = int_to_ptr.vmem [resolvable:$true] %s317_s2 }
 0x18a   :  { %s2488_s30 = scalar_lea.hbm %s3092_s29, 256 }
 0x18b   :  { %p2489_p12 = scmp.ne.s32.totalorder %s3092_s29, %s2488_s30  ;;  %p2492_p13 = scmp.lt.u32.totalorder %s2488_s30, %s3092_s29 }
 0x18d   :  { %p2494_p0 = pnand %p2492_p13, %p2489_p12 }
 0x18f   :  { %2497 = shalt.err (!%p2494_p0)
}
 0x190   :  { %s2498_s17 = scalar_lea.vmem %s290_s20, 256  ;;  %p2503_p2 = scmp.lt.s32.totalorder %s290_s20, %s290_s20 }
 0x191   :  { %p2499_p1 = scmp.ne.s32.totalorder %s290_s20, %s2498_s17  ;;  %p2504_p3 = scmp.lt.s32.totalorder %s2498_s17, %s2498_s17 }
 0x193   :  { %p2505_p4 = por %p2504_p3, %p2503_p2 }
 0x195   :  { %p2506_p5 = pnand %p2505_p4, %p2499_p1 }
 0x197   :  { %2509 = shalt.err (!%p2506_p5)
}
 0x198   :  { %s3093_s7 = sld [smem:[#allocation59_spill]] }
 0x199   :  { %295 = dma.hbm_to_vmem [thread:$0]  %s3092_s29, 256, %s290_s20, [#allocation30], %s2608_s15, %s2608_s15, %s2609_s16  }
 0x19e   :  { %s2510_s5 = scalar_lea.hbm %s3093_s7, 512 }
 0x19f   :  { %p2511_p6 = scmp.ne.s32.totalorder %s3093_s7, %s2510_s5  ;;  %p2514_p7 = scmp.lt.u32.totalorder %s2510_s5, %s3093_s7 }
 0x1a1   :  { %p2516_p8 = pnand %p2514_p7, %p2511_p6 }
 0x1a3   :  { %2519 = shalt.err (!%p2516_p8)
}
 0x1a4   :  { %s2520_s10 = scalar_lea.vmem %s318_s2, 512  ;;  %p2525_p10 = scmp.lt.s32.totalorder %s318_s2, %s318_s2 }
 0x1a5   :  { %p2521_p9 = scmp.ne.s32.totalorder %s318_s2, %s2520_s10  ;;  %p2526_p11 = scmp.lt.s32.totalorder %s2520_s10, %s2520_s10 }
 0x1a7   :  { %p2527_p12 = por %p2526_p11, %p2525_p10 }
 0x1a9   :  { %p2528_p13 = pnand %p2527_p12, %p2521_p9 }
 0x1ab   :  { %2531 = shalt.err (!%p2528_p13)
}
 0x1ac   :  { %323 = dma.hbm_to_vmem [thread:$0]  %s3093_s7, 512, %s318_s2, [#allocation33], %s2608_s15, %s2608_s15, %s2609_s16  }
 0x1ad   :  { %2554 = dma.done.wait [#allocation3], 256  }
 0x1ae   :  { %2555 = vsyncadd [#allocation3], 4294967040 }
 0x1af   :  { %2556 = dma.done.wait [#allocation6], 640  }
 0x1b0   :  { %2557 = vsyncadd [#allocation6], 4294966656 }
 0x1b1   :  { %2558 = dma.done.wait [#allocation9], 272  }
 0x1b2   :  { %2559 = vsyncadd [#allocation9], 4294967024 }
 0x1b3   :  { %2560 = dma.done.wait [#allocation12], 528  }
 0x1b4   :  { %2561 = vsyncadd [#allocation12], 4294966768 }
 0x1b5   :  { %2562 = dma.done.wait [#allocation15], 528  }
 0x1b6   :  { %2563 = vsyncadd [#allocation15], 4294966768 }
 0x1b7   :  { %2564 = dma.done.wait [#allocation18], 272  }
 0x1b8   :  { %2565 = vsyncadd [#allocation18], 4294967024 }
 0x1b9   :  { %2566 = dma.done.wait [#allocation21], 272  }
 0x1ba   :  { %2567 = vsyncadd [#allocation21], 4294967024 }
 0x1bb   :  { %2568 = dma.done.wait [#allocation24], 528  }
 0x1bc   :  { %2569 = vsyncadd [#allocation24], 4294966768 }
 0x1bd   :  { %2570 = dma.done.wait [#allocation27], 528  }
 0x1be   :  { %2571 = vsyncadd [#allocation27], 4294966768 }
 0x1bf   :  { %2572 = dma.done.wait [#allocation30], 512  }
 0x1c0   :  { %2573 = vsyncadd [#allocation30], 4294966784 }
 0x1c1   :  { %2574 = dma.done.wait [#allocation33], 1024  }
 0x1c2   :  { %2575 = vsyncadd [#allocation33], 4294966272  ;;  %v2632_v0 = vmov 0.0   ;;  %vm2633_vm0 = vmmov 0   ;;  %v1997_v1 = vld [vmem:[#allocation7] sm:$0xff]   ;;  %v1998_v2 = vld [vmem:[#allocation7 + $0x8] sm:$0xff]  }
 0x1c3   :  { %1792 = vmatprep.subr.bf16.mxu1 %v2632_v0  ;;  %1784 = vmatprep.subr.bf16.mxu0 %v2632_v0  ;;  %v1999_v3 = vld [vmem:[#allocation8] sm:$0xff]   ;;  %v2001_v4 = vld [vmem:[#allocation8 + $0x8] sm:$0xff]   ;;  %v2000_v5 = vld [vmem:[#allocation7 + $0x10] sm:$0xff]   ;;  %vm428_vm1 = vcmask 261120   ;;  %vm497_vm2 = vcmask 523264   ;;  %s3094_s15 = sld [smem:[#allocation50_spill]] }
 0x1c4   :  { %1788 = vmatprep.mubr.msk.bf16.mxu0 %vm2633_vm0, %v2632_v0  ;;  %1800 = vmatprep.mubr.msk.bf16.mxu1 %vm2633_vm0, %v2632_v0  ;;  %v2925_v6 = vld [vmem:[#allocation5] sm:$0xff]   ;;  %v2927_v8 = vld [vmem:[#allocation2] sm:$0xff]  ;;  %v2929_v9 = vld [vmem:[#allocation2 + $0x8] sm:$0xff]  ;;  %s3095_s16 = sld [smem:[#allocation55_spill]]  ;;  %s3096_s0 = sld [smem:[#allocation54_spill]] }
 0x1c5   :  { %1793 = vmatpush3.bf16.msra.mxu1 %v1997_v1  ;;  %1785 = vmatpush3.bf16.msra.mxu0 %v1999_v3  ;;  %v2003_v7 = vld [vmem:[#allocation7 + $0x18] sm:$0xff]   ;;  %v398_v11 = vpack.c.bf16 %v2929_v9, %v2927_v8  ;;  %v2006_v13 = vld [vmem:[#allocation11 + $0x10] sm:$0xff]   ;;  %v2007_v14 = vld [vmem:[#allocation11 + $0x18] sm:$0xff]   ;;  %s3097_s13 = sld [smem:[#allocation57_spill]]  ;;  %s3098_s11 = sld [smem:[#allocation58_spill]] }
 0x1c6   :  { %1794 = vmatprep.subr.bf16.mxu1 %v2632_v0  ;;  %1786 = vmatprep.subr.bf16.mxu0 %v2632_v0  ;;  %v2004_v10 = vld [vmem:[#allocation11] sm:$0xff]   ;;  %v2005_v12 = vld [vmem:[#allocation11 + $0x8] sm:$0xff]   ;;  %v1648_v24 = vld [vmem:[#allocation10] ss:$0 sm:$0xff] }
 0x1c7   :  { %v2008_v15 = vld [vmem:[#allocation14] sm:$0xff]   ;;  %v2009_v16 = vld [vmem:[#allocation14 + $0x8] sm:$0xff]   ;;  %v2010_v31 = vld [vmem:[#allocation14 + $0x10] sm:$0xff]  }
 0x1c8   :  { %v2011_v32 = vld [vmem:[#allocation14 + $0x18] sm:$0xff]   ;;  %v2012_v33 = vld [vmem:[#allocation17] sm:$0xff]   ;;  %v2013_v34 = vld [vmem:[#allocation17 + $0x8] sm:$0xff]  }
 0x1c9   :  { %1795 = vmatpush3.bf16.msra.mxu1 %v1998_v2  ;;  %1787 = vmatpush3.bf16.msra.mxu0 %v2001_v4  ;;  %v1649_v35 = vld [vmem:[#allocation13] ss:$0 sm:$0xff]  ;;  %v2014_v43 = vld [vmem:[%s3094_s15] sm:$0xff]   ;;  %v2017_v50 = vld [vmem:[%s3094_s15 + $0x10] sm:$0xff]  }
 0x1ca   :  { %1796 = vmatprep.subr.bf16.mxu1 %v2632_v0  ;;  %1804 = vmatprep.subr.bf16.mxu0 %v2632_v0  ;;  %v2015_v46 = vld [vmem:[%s3094_s15 + $0x8] sm:$0xff]   ;;  %v2016_v48 = vld [vmem:[#allocation20] sm:$0xff]   ;;  %v2019_v52 = vld [vmem:[%s3094_s15 + $0x18] sm:$0xff]  }
 0x1cb   :  { %v2018_v51 = vld [vmem:[#allocation20 + $0x8] sm:$0xff]   ;;  %v2020_v53 = vld [vmem:[#allocation23] sm:$0xff]   ;;  %v2021_v54 = vld [vmem:[#allocation23 + $0x8] sm:$0xff]  }
 0x1cc   :  { %1789 = vmatmul.mubr.msk.bf16.vlgmr.msra.gmra.mrb[0].mxu0 %vm428_vm1, %v2925_v6  ;;  %v1655_v55 = vld [vmem:[#allocation16] ss:$0 sm:$0xff] }
 0x1cd   :  { %1797 = vmatpush3.bf16.msra.mxu1 %v2000_v5  ;;  %1805 = vmatpush3.bf16.msra.mxu0 %v2004_v10  ;;  %v1661_v5 = vld [vmem:[#allocation19] ss:$0 sm:$0xff] }
 0x1ce   :  { %1798 = vmatprep.subr.bf16.mxu1 %v2632_v0  ;;  %1812 = vmatprep.mubr.msk.bf16.mxu0 %vm2633_vm0, %v2632_v0 }
 0x1cf   :  { %1806 = vmatprep.subr.bf16.mxu0 %v2632_v0 }
 0x1d1   :  { %1799 = vmatpush3.bf16.msra.mxu1 %v2003_v7  ;;  %1807 = vmatpush3.bf16.msra.mxu0 %v2005_v12 }
 0x1d2   :  { %1816 = vmatprep.subr.bf16.mxu1 %v2632_v0  ;;  %1808 = vmatprep.subr.bf16.mxu0 %v2632_v0 }
 0x1d4   :  { %1801 = vmatmul.mubr.msk.bf16.vlgmr.msra.gmra.mrb[0].mxu1 %vm497_vm2, %v398_v11 }
 0x1d5   :  { %1824 = vmatprep.mubr.msk.bf16.mxu1 %vm2633_vm0, %v2632_v0  ;;  %1809 = vmatpush3.bf16.msra.mxu0 %v2006_v13 }
 0x1d6   :  { %1810 = vmatprep.subr.bf16.mxu0 %v2632_v0  ;;  %1817 = vmatpush3.bf16.msra.mxu1 %v2008_v15 }
 0x1d7   :  { %1818 = vmatprep.subr.bf16.mxu1 %v2632_v0 }
 0x1d9   :  { %1811 = vmatpush3.bf16.msra.mxu0 %v2007_v14 }
 0x1da   :  { %1828 = vmatprep.subr.bf16.mxu0 %v2632_v0  ;;  %1819 = vmatpush3.bf16.msra.mxu1 %v2009_v16 }
 0x1db   :  { %1820 = vmatprep.subr.bf16.mxu1 %v2632_v0 }
 0x1de   :  { %1821 = vmatpush3.bf16.msra.mxu1 %v2010_v31 }
 0x1df   :  { %1822 = vmatprep.subr.bf16.mxu1 %v2632_v0 }
 0x1e2   :  { %1823 = vmatpush3.bf16.msra.mxu1 %v2011_v32 }
 0x1e3   :  { %1844 = vmatprep.subr.bf16.mxu1 %v2632_v0 }
 0x29f   :  { %v466_v17 = vpop.f32.mrb[0].mxu0 }
 0x2a0   :  { %v1790_v18 = vpop.f32.mrb[1].mxu0 }
 0x2a1   :  { %v469_v19 = vpop.f32.mrb[2].mxu0 }
 0x2a2   :  { %v1791_v20 = vpop.f32.mrb[3].mxu0 }
 0x2a7   :  { %v535_v21 = vpop.f32.mrb[0].mxu1 }
 0x2a8   :  { %v536_v22 = vadd.f32 %v535_v21, %v466_v17  ;;  %v1802_v23 = vpop.f32.mrb[1].mxu1 }
 0x2a9   :  { %v538_v25 = vpop.f32.mrb[2].mxu1  ;;  %v2025_v23 = vld [vmem:[#allocation26 + $0x8] sm:$0xff]  }
 0x2aa   :  { %v539_v26 = vadd.f32 %v538_v25, %v469_v19  ;;  %v1803_v27 = vpop.f32.mrb[3].mxu1  ;;  %v549_v28 = vadd.f32 %v1648_v24, %v536_v22  ;;  %v2022_v22 = vld [vmem:[#allocation23 + $0x10] sm:$0xff]  }
 0x2ab   :  { %v1675_v27 = vld [vmem:[#allocation22] ss:$0 sm:$0xff] }
 0x2ac   :  { %v550_v29 = vadd.f32 %v1648_v24, %v539_v26 }
 0x2ae   :  { %v551_v30 = vpack.c.bf16 %v550_v29, %v549_v28 }
 0x2b0   :  { %1813 = vmatmul.mubr.msk.bf16.vlgmr.msra.gmra.mrb[4].mxu0 %vm497_vm2, %v551_v30 }
 0x2b1   :  { %1832 = vmatprep.mubr.msk.bf16.mxu0 %vm2633_vm0, %v2632_v0  ;;  %1829 = vmatpush3.bf16.msra.mxu0 %v2012_v33 }
 0x2b2   :  { %1830 = vmatprep.subr.bf16.mxu0 %v2632_v0 }
 0x2b5   :  { %1831 = vmatpush3.bf16.msra.mxu0 %v2013_v34  ;;  %v2026_v34 = vld [vmem:[#allocation26 + $0x10] sm:$0xff]  }
 0x2b6   :  { %1836 = vmatprep.subr.bf16.mxu0 %v2632_v0 }
 0x2b8   :  { %1833 = vmatmul.mubr.msk.bf16.vlgmr.msra.gmra.mrb[8].mxu0 %vm428_vm1, %v2925_v6 }
 0x2b9   :  { %1840 = vmatprep.mubr.msk.bf16.mxu0 %vm2633_vm0, %v2632_v0  ;;  %1837 = vmatpush3.bf16.msra.mxu0 %v2016_v48 }
 0x2ba   :  { %1838 = vmatprep.subr.bf16.mxu0 %v2632_v0 }
 0x2bd   :  { %1839 = vmatpush3.bf16.msra.mxu0 %v2018_v51  ;;  %v2032_v51 = vld [vmem:[#allocation31] sm:$0xff]  }
 0x2be   :  { %1856 = vmatprep.subr.bf16.mxu0 %v2632_v0 }
 0x2c0   :  { %1841 = vmatmul.mubr.msk.bf16.vlgmr.msra.gmra.mrb[12].mxu0 %vm428_vm1, %v2925_v6 }
 0x2c1   :  { %1864 = vmatprep.mubr.msk.bf16.mxu0 %vm2633_vm0, %v2632_v0  ;;  %1857 = vmatpush3.bf16.msra.mxu0 %v2020_v53  ;;  %v2033_v53 = vld [vmem:[%s3095_s16 + $0x10] sm:$0xff]  }
 0x2c2   :  { %1858 = vmatprep.subr.bf16.mxu0 %v2632_v0 }
 0x2c5   :  { %1859 = vmatpush3.bf16.msra.mxu0 %v2021_v54  ;;  %v2034_v54 = vld [vmem:[#allocation31 + $0x8] sm:$0xff]  }
 0x2c6   :  { %1860 = vmatprep.subr.bf16.mxu0 %v2632_v0 }
 0x2c9   :  { %1861 = vmatpush3.bf16.msra.mxu0 %v2022_v22 }
 0x2ca   :  { %1862 = vmatprep.subr.bf16.mxu0 %v2632_v0 }
 0x383   :  { %v628_v36 = vpop.f32.mrb[4].mxu0 }
 0x384   :  { %v1814_v37 = vpop.f32.mrb[5].mxu0  ;;  %v629_v39 = vadd.f32 %v1649_v35, %v628_v36  ;;  %v2028_v36 = vld [vmem:[#allocation29] sm:$0xff]  }
 0x385   :  { %v631_v38 = vpop.f32.mrb[6].mxu0  ;;  %v2029_v37 = vld [vmem:[#allocation29 + $0x8] sm:$0xff]  }
 0x386   :  { %v632_v40 = vadd.f32 %v1649_v35, %v631_v38  ;;  %v1815_v41 = vpop.f32.mrb[7].mxu0  ;;  %v2027_v35 = vld [vmem:[#allocation26 + $0x18] sm:$0xff]  }
 0x387   :  { %v1676_v38 = vld [vmem:[#allocation25] ss:$0 sm:$0xff] }
 0x388   :  { %v635_v42 = vpack.c.bf16 %v632_v40, %v629_v39 }
 0x38a   :  { %1825 = vmatmul.mubr.msk.bf16.vlgmr.msra.gmra.mrb[4].mxu1 %vm497_vm2, %v635_v42 }
 0x38b   :  { %1852 = vmatprep.mubr.msk.bf16.mxu1 %vm2633_vm0, %v2632_v0  ;;  %v776_v44 = vpop.f32.mrb[8].mxu0  ;;  %1845 = vmatpush3.bf16.msra.mxu1 %v2014_v43 }
 0x38c   :  { %v1834_v45 = vpop.f32.mrb[9].mxu0  ;;  %1846 = vmatprep.subr.bf16.mxu1 %v2632_v0  ;;  %v777_v7 = vadd.f32 %v1661_v5, %v776_v44 }
 0x38d   :  { %v779_v47 = vpop.f32.mrb[10].mxu0 }
 0x38e   :  { %v1835_v49 = vpop.f32.mrb[11].mxu0  ;;  %v780_v12 = vadd.f32 %v1661_v5, %v779_v47 }
 0x38f   :  { %1847 = vmatpush3.bf16.msra.mxu1 %v2015_v46  ;;  %v2030_v46 = vld [vmem:[%s3095_s16] sm:$0xff]   ;;  %v2031_v49 = vld [vmem:[%s3095_s16 + $0x8] sm:$0xff]  }
 0x390   :  { %1848 = vmatprep.subr.bf16.mxu1 %v2632_v0 }
 0x393   :  { %1849 = vmatpush3.bf16.msra.mxu1 %v2017_v50  ;;  %v858_v18 = vpop.f32.mrb[12].mxu0 }
 0x394   :  { %1850 = vmatprep.subr.bf16.mxu1 %v2632_v0  ;;  %v1842_v19 = vpop.f32.mrb[13].mxu0 }
 0x395   :  { %v861_v20 = vpop.f32.mrb[14].mxu0 }
 0x396   :  { %v1843_v21 = vpop.f32.mrb[15].mxu0 }
 0x397   :  { %1851 = vmatpush3.bf16.msra.mxu1 %v2019_v52 }
 0x398   :  { %1868 = vmatprep.subr.bf16.mxu1 %v2632_v0 }
 0x45d   :  { %v712_v56 = vpop.f32.mrb[4].mxu1 }
 0x45e   :  { %v713_v57 = vadd.f32 %v1655_v55, %v712_v56  ;;  %v1826_v58 = vpop.f32.mrb[5].mxu1  ;;  %v2036_v56 = vld [vmem:[#allocation32] sm:$0xff]  }
 0x45f   :  { %v715_v59 = vpop.f32.mrb[6].mxu1  ;;  %v1682_v58 = vld [vmem:[#allocation28] ss:$0 sm:$0xff] }
 0x460   :  { %v1665_v60 = vmul.f32 -1.442695, %v713_v57  ;;  %v716_v61 = vadd.f32 %v1655_v55, %v715_v59  ;;  %v1827_v62 = vpop.f32.mrb[7].mxu1  ;;  %v2035_v55 = vld [vmem:[%s3095_s16 + $0x18] sm:$0xff]  }
 0x461   :  { %v2037_v57 = vld [vmem:[#allocation32 + $0x8] sm:$0xff]  }
 0x462   :  { %2046 = vpow2.f32 %v1665_v60  ;;  %v1666_v63 = vmul.f32 -1.442695, %v716_v61 }
 0x464   :  { %2048 = vpow2.f32 %v1666_v63 }
 0x46c   :  { %v2047_v1 = vpop.eup %2046 }
 0x46d   :  { %v789_v2 = vadd.f32 1.0, %v2047_v1 }
 0x46e   :  { %v2049_v3 = vpop.eup %2048 }
 0x46f   :  { %2050 = vrcp.f32 %v789_v2  ;;  %v790_v4 = vadd.f32 1.0, %v2049_v3 }
 0x471   :  { %2052 = vrcp.f32 %v790_v4 }
 0x479   :  { %v2051_v10 = vpop.eup %2050 }
 0x47a   :  { %v795_v11 = vmul.f32 %v2051_v10, %v777_v7 }
 0x47b   :  { %v2053_v13 = vpop.eup %2052 }
 0x47c   :  { %v796_v14 = vmul.f32 %v2053_v13, %v780_v12  ;;  %v2980_v15 = vadd.f32 %v795_v11, %v2927_v8  ;;  %v2023_v8 = vld [vmem:[#allocation23 + $0x18] sm:$0xff]   ;;  %v1688_v11 = vld [vmem:[%s3096_s0] ss:$0 sm:$0xff] }
 0x47d   :  { %1863 = vmatpush3.bf16.msra.mxu0 %v2023_v8 }
 0x47e   :  { %v2983_v16 = vadd.f32 %v796_v14, %v2929_v9  ;;  %1880 = vmatprep.subr.bf16.mxu0 %v2632_v0  ;;  %v2024_v9 = vld [vmem:[#allocation26] sm:$0xff]  }
 0x480   :  { %v799_v17 = vpack.c.bf16 %v2983_v16, %v2980_v15 }
 0x482   :  { %1853 = vmatmul.mubr.msk.bf16.vlgmr.msra.gmra.mrb[8].mxu1 %vm497_vm2, %v799_v17 }
 0x483   :  { %1876 = vmatprep.mubr.msk.bf16.mxu1 %vm2633_vm0, %v2632_v0  ;;  %1869 = vmatpush3.bf16.msra.mxu1 %v2024_v9 }
 0x484   :  { %1870 = vmatprep.subr.bf16.mxu1 %v2632_v0 }
 0x487   :  { %1871 = vmatpush3.bf16.msra.mxu1 %v2025_v23 }
 0x488   :  { %1872 = vmatprep.subr.bf16.mxu1 %v2632_v0 }
 0x48b   :  { %1873 = vmatpush3.bf16.msra.mxu1 %v2026_v34 }
 0x48c   :  { %1874 = vmatprep.subr.bf16.mxu1 %v2632_v0 }
 0x48f   :  { %1875 = vmatpush3.bf16.msra.mxu1 %v2027_v35 }
 0x490   :  { %1896 = vmatprep.subr.bf16.mxu1 %v2632_v0 }
 0x555   :  { %v926_v24 = vpop.f32.mrb[8].mxu1 }
 0x556   :  { %v927_v25 = vadd.f32 %v926_v24, %v858_v18  ;;  %v1854_v26 = vpop.f32.mrb[9].mxu1 }
 0x557   :  { %v929_v28 = vpop.f32.mrb[10].mxu1  ;;  %v2041_v26 = vld [vmem:[#allocation34 + $0x8] sm:$0xff]  }
 0x558   :  { %v930_v29 = vadd.f32 %v929_v28, %v861_v20  ;;  %v1855_v30 = vpop.f32.mrb[11].mxu1  ;;  %v940_v31 = vadd.f32 %v1675_v27, %v927_v25  ;;  %v2038_v25 = vld [vmem:[#allocation32 + $0x10] sm:$0xff]  }
 0x559   :  { %v1702_v30 = vld [vmem:[%s3097_s13] ss:$0 sm:$0xff] }
 0x55a   :  { %v941_v32 = vadd.f32 %v1675_v27, %v930_v29 }
 0x55c   :  { %v942_v33 = vpack.c.bf16 %v941_v32, %v940_v31 }
 0x55e   :  { %1865 = vmatmul.mubr.msk.bf16.vlgmr.msra.gmra.mrb[16].mxu0 %vm497_vm2, %v942_v33 }
 0x55f   :  { %1884 = vmatprep.mubr.msk.bf16.mxu0 %vm2633_vm0, %v2632_v0  ;;  %1881 = vmatpush3.bf16.msra.mxu0 %v2028_v36 }
 0x560   :  { %1882 = vmatprep.subr.bf16.mxu0 %v2632_v0 }
 0x563   :  { %1883 = vmatpush3.bf16.msra.mxu0 %v2029_v37  ;;  %v2042_v37 = vld [vmem:[#allocation34 + $0x10] sm:$0xff]  }
 0x564   :  { %1888 = vmatprep.subr.bf16.mxu0 %v2632_v0 }
 0x566   :  { %1885 = vmatmul.mubr.msk.bf16.vlgmr.msra.gmra.mrb[20].mxu0 %vm428_vm1, %v2925_v6 }
 0x567   :  { %1892 = vmatprep.mubr.msk.bf16.mxu0 %vm2633_vm0, %v2632_v0  ;;  %1889 = vmatpush3.bf16.msra.mxu0 %v2032_v51 }
 0x568   :  { %1890 = vmatprep.subr.bf16.mxu0 %v2632_v0 }
 0x56b   :  { %1891 = vmatpush3.bf16.msra.mxu0 %v2034_v54 }
 0x56c   :  { %1908 = vmatprep.subr.bf16.mxu0 %v2632_v0 }
 0x56e   :  { %1893 = vmatmul.mubr.msk.bf16.vlgmr.msra.gmra.mrb[24].mxu0 %vm428_vm1, %v2925_v6 }
 0x56f   :  { %1916 = vmatprep.mubr.msk.bf16.mxu0 %vm2633_vm0, %v2632_v0  ;;  %1909 = vmatpush3.bf16.msra.mxu0 %v2036_v56 }
 0x570   :  { %1910 = vmatprep.subr.bf16.mxu0 %v2632_v0 }
 0x573   :  { %1911 = vmatpush3.bf16.msra.mxu0 %v2037_v57 }
 0x574   :  { %1912 = vmatprep.subr.bf16.mxu0 %v2632_v0 }
 0x577   :  { %1913 = vmatpush3.bf16.msra.mxu0 %v2038_v25 }
 0x578   :  { %1914 = vmatprep.subr.bf16.mxu0 %v2632_v0 }
 0x631   :  { %v1019_v39 = vpop.f32.mrb[16].mxu0 }
 0x632   :  { %v1866_v40 = vpop.f32.mrb[17].mxu0  ;;  %v1020_v42 = vadd.f32 %v1676_v38, %v1019_v39  ;;  %v2044_v39 = vld [vmem:[%s2778_s8] sm:$0xff]  }
 0x633   :  { %v1022_v41 = vpop.f32.mrb[18].mxu0  ;;  %v2045_v40 = vld [vmem:[%s2778_s8 + $0x8] sm:$0xff]   ;;  %s2634_s8 = smov [#allocation35]  }
 0x634   :  { %v1023_v43 = vadd.f32 %v1676_v38, %v1022_v41  ;;  %v1867_v44 = vpop.f32.mrb[19].mxu0  ;;  %v2043_v38 = vld [vmem:[#allocation34 + $0x18] sm:$0xff]   ;;  %v1703_v41 = vld [vmem:[%s3098_s11] ss:$0 sm:$0xff] }
 0x636   :  { %v1026_v45 = vpack.c.bf16 %v1023_v43, %v1020_v42 }
 0x638   :  { %1877 = vmatmul.mubr.msk.bf16.vlgmr.msra.gmra.mrb[12].mxu1 %vm497_vm2, %v1026_v45 }
 0x639   :  { %1904 = vmatprep.mubr.msk.bf16.mxu1 %vm2633_vm0, %v2632_v0  ;;  %v1167_v47 = vpop.f32.mrb[20].mxu0  ;;  %1897 = vmatpush3.bf16.msra.mxu1 %v2030_v46 }
 0x63a   :  { %v1886_v48 = vpop.f32.mrb[21].mxu0  ;;  %1898 = vmatprep.subr.bf16.mxu1 %v2632_v0  ;;  %v1168_v12 = vadd.f32 %v1688_v11, %v1167_v47 }
 0x63b   :  { %v1170_v50 = vpop.f32.mrb[22].mxu0 }
 0x63c   :  { %v1887_v52 = vpop.f32.mrb[23].mxu0  ;;  %v1171_v17 = vadd.f32 %v1688_v11, %v1170_v50 }
 0x63d   :  { %1899 = vmatpush3.bf16.msra.mxu1 %v2031_v49 }
 0x63e   :  { %1900 = vmatprep.subr.bf16.mxu1 %v2632_v0 }
 0x641   :  { %1901 = vmatpush3.bf16.msra.mxu1 %v2033_v53  ;;  %v1249_v8 = vpop.f32.mrb[24].mxu0 }
 0x642   :  { %1902 = vmatprep.subr.bf16.mxu1 %v2632_v0  ;;  %v1894_v9 = vpop.f32.mrb[25].mxu0 }
 0x643   :  { %v1252_v23 = vpop.f32.mrb[26].mxu0 }
 0x644   :  { %v1895_v24 = vpop.f32.mrb[27].mxu0 }
 0x645   :  { %1903 = vmatpush3.bf16.msra.mxu1 %v2035_v55 }
 0x646   :  { %1920 = vmatprep.subr.bf16.mxu1 %v2632_v0 }
 0x70b   :  { %v1103_v59 = vpop.f32.mrb[12].mxu1 }
 0x70c   :  { %v1104_v60 = vadd.f32 %v1682_v58, %v1103_v59  ;;  %v1878_v61 = vpop.f32.mrb[13].mxu1 }
 0x70d   :  { %v1106_v62 = vpop.f32.mrb[14].mxu1 }
 0x70e   :  { %v1692_v63 = vmul.f32 -1.442695, %v1104_v60  ;;  %v1107_v1 = vadd.f32 %v1682_v58, %v1106_v62  ;;  %v1879_v2 = vpop.f32.mrb[15].mxu1 }
 0x710   :  { %2054 = vpow2.f32 %v1692_v63  ;;  %v1693_v3 = vmul.f32 -1.442695, %v1107_v1  ;;  %v1715_v1 = vld [vmem:[%s2783_s6] ss:$0 sm:$0xff] }
 0x712   :  { %2056 = vpow2.f32 %v1693_v3 }
 0x71a   :  { %v2055_v4 = vpop.eup %2054 }
 0x71b   :  { %v1180_v5 = vadd.f32 1.0, %v2055_v4 }
 0x71c   :  { %v2057_v7 = vpop.eup %2056 }
 0x71d   :  { %2058 = vrcp.f32 %v1180_v5  ;;  %v1181_v10 = vadd.f32 1.0, %v2057_v7 }
 0x71f   :  { %2060 = vrcp.f32 %v1181_v10 }
 0x727   :  { %v2059_v13 = vpop.eup %2058 }
 0x728   :  { %v1186_v14 = vmul.f32 %v2059_v13, %v1168_v12 }
 0x729   :  { %v2061_v18 = vpop.eup %2060 }
 0x72a   :  { %v1187_v19 = vmul.f32 %v2061_v18, %v1171_v17  ;;  %v3026_v20 = vadd.f32 %v1186_v14, %v2980_v15  ;;  %v2039_v15 = vld [vmem:[#allocation32 + $0x18] sm:$0xff]  }
 0x72b   :  { %1915 = vmatpush3.bf16.msra.mxu0 %v2039_v15 }
 0x72c   :  { %v3029_v21 = vadd.f32 %v1187_v19, %v2983_v16  ;;  %1932 = vmatprep.subr.bf16.mxu0 %v2632_v0  ;;  %v2040_v16 = vld [vmem:[#allocation34] sm:$0xff]  }
 0x72e   :  { %v1190_v22 = vpack.c.bf16 %v3029_v21, %v3026_v20 }
 0x730   :  { %1905 = vmatmul.mubr.msk.bf16.vlgmr.msra.gmra.mrb[16].mxu1 %vm497_vm2, %v1190_v22 }
 0x731   :  { %1928 = vmatprep.mubr.msk.bf16.mxu1 %vm2633_vm0, %v2632_v0  ;;  %1921 = vmatpush3.bf16.msra.mxu1 %v2040_v16 }
 0x732   :  { %1922 = vmatprep.subr.bf16.mxu1 %v2632_v0 }
 0x735   :  { %1923 = vmatpush3.bf16.msra.mxu1 %v2041_v26 }
 0x736   :  { %1924 = vmatprep.subr.bf16.mxu1 %v2632_v0 }
 0x739   :  { %1925 = vmatpush3.bf16.msra.mxu1 %v2042_v37 }
 0x73a   :  { %1926 = vmatprep.subr.bf16.mxu1 %v2632_v0 }
 0x73d   :  { %1927 = vmatpush3.bf16.msra.mxu1 %v2043_v38 }
 0x803   :  { %v1317_v27 = vpop.f32.mrb[16].mxu1 }
 0x804   :  { %v1318_v28 = vadd.f32 %v1317_v27, %v1249_v8  ;;  %v1906_v29 = vpop.f32.mrb[17].mxu1 }
 0x805   :  { %v1320_v31 = vpop.f32.mrb[18].mxu1 }
 0x806   :  { %v1321_v32 = vadd.f32 %v1320_v31, %v1252_v23  ;;  %v1907_v33 = vpop.f32.mrb[19].mxu1  ;;  %v1331_v34 = vadd.f32 %v1702_v30, %v1318_v28 }
 0x808   :  { %v1332_v35 = vadd.f32 %v1702_v30, %v1321_v32 }
 0x80a   :  { %v1333_v36 = vpack.c.bf16 %v1332_v35, %v1331_v34 }
 0x80c   :  { %1917 = vmatmul.mubr.msk.bf16.vlgmr.msra.gmra.mrb[28].mxu0 %vm497_vm2, %v1333_v36 }
 0x80d   :  { %1936 = vmatprep.mubr.msk.bf16.mxu0 %vm2633_vm0, %v2632_v0  ;;  %1933 = vmatpush3.bf16.msra.mxu0 %v2044_v39 }
 0x80e   :  { %1934 = vmatprep.subr.bf16.mxu0 %v2632_v0  ;;  %v1709_v0 = vld [vmem:[%s2773_s19] ss:$0 sm:$0xff]  ;;  %s1588_s19 = sshll.u32 %s2634_s8, 4  ;;  %s1589_s19 = int_to_ptr.vmem [resolvable:$true] %s1588_s19 }
 0x80f   :  { %s2532_s12 = scalar_lea.vmem %s1589_s19, 256  ;;  %p2537_p1 = scmp.lt.s32.totalorder %s1589_s19, %s1589_s19 }
 0x810   :  { %p2533_p0 = scmp.ne.s32.totalorder %s1589_s19, %s2532_s12  ;;  %p2538_p2 = scmp.lt.s32.totalorder %s2532_s12, %s2532_s12 }
 0x811   :  { %1935 = vmatpush3.bf16.msra.mxu0 %v2045_v40 }
 0x812   :  { %p2539_p3 = por %p2538_p2, %p2537_p1 }
 0x814   :  { %1937 = vmatmul.mubr.msk.bf16.vlgmr.msra.gmra.mrb[32].mxu0 %vm428_vm1, %v2925_v6  ;;  %p2540_p4 = pnand %p2539_p3, %p2533_p0 }
 0x8df   :  { %v1410_v42 = vpop.f32.mrb[28].mxu0 }
 0x8e0   :  { %v1918_v43 = vpop.f32.mrb[29].mxu0  ;;  %v1411_v45 = vadd.f32 %v1703_v41, %v1410_v42 }
 0x8e1   :  { %v1413_v44 = vpop.f32.mrb[30].mxu0 }
 0x8e2   :  { %v1414_v46 = vadd.f32 %v1703_v41, %v1413_v44  ;;  %v1919_v47 = vpop.f32.mrb[31].mxu0 }
 0x8e4   :  { %v1417_v48 = vpack.c.bf16 %v1414_v46, %v1411_v45 }
 0x8e6   :  { %1929 = vmatmul.mubr.msk.bf16.vlgmr.msra.gmra.mrb[20].mxu1 %vm497_vm2, %v1417_v48 }
 0x8e7   :  { %v1558_v49 = vpop.f32.mrb[32].mxu0 }
 0x8e8   :  { %v1938_v50 = vpop.f32.mrb[33].mxu0  ;;  %v1559_v2 = vadd.f32 %v1715_v1, %v1558_v49 }
 0x8e9   :  { %v1561_v51 = vpop.f32.mrb[34].mxu0 }
 0x8ea   :  { %v1939_v52 = vpop.f32.mrb[35].mxu0  ;;  %v1562_v5 = vadd.f32 %v1715_v1, %v1561_v51 }
 0x9b9   :  { %v1494_v53 = vpop.f32.mrb[20].mxu1 }
 0x9ba   :  { %v1495_v54 = vadd.f32 %v1709_v0, %v1494_v53  ;;  %v1930_v55 = vpop.f32.mrb[21].mxu1 }
 0x9bb   :  { %v1497_v6 = vpop.f32.mrb[22].mxu1 }
 0x9bc   :  { %v1719_v56 = vmul.f32 -1.442695, %v1495_v54  ;;  %v1498_v57 = vadd.f32 %v1709_v0, %v1497_v6  ;;  %v1931_v58 = vpop.f32.mrb[23].mxu1 }
 0x9be   :  { %2062 = vpow2.f32 %v1719_v56  ;;  %v1720_v59 = vmul.f32 -1.442695, %v1498_v57 }
 0x9c0   :  { %2064 = vpow2.f32 %v1720_v59 }
 0x9c8   :  { %v2063_v60 = vpop.eup %2062 }
 0x9c9   :  { %v1571_v61 = vadd.f32 1.0, %v2063_v60 }
 0x9ca   :  { %v2065_v62 = vpop.eup %2064 }
 0x9cb   :  { %2066 = vrcp.f32 %v1571_v61  ;;  %v1572_v63 = vadd.f32 1.0, %v2065_v62 }
 0x9cd   :  { %2068 = vrcp.f32 %v1572_v63 }
 0x9d5   :  { %v2067_v3 = vpop.eup %2066 }
 0x9d6   :  { %v1577_v4 = vmul.f32 %v2067_v3, %v1559_v2 }
 0x9d7   :  { %v2069_v7 = vpop.eup %2068 }
 0x9d8   :  { %v1579_v10 = vadd.f32 %v1577_v4, %v3026_v20  ;;  %v1578_v11 = vmul.f32 %v2069_v7, %v1562_v5 }
 0x9da   :  { %1581 = vst.msk [vmem:[#allocation35] sm:$0xff] %vm497_vm2, %v1579_v10  ;;  %v1580_v12 = vadd.f32 %v1578_v11, %v3029_v21 }
 0x9dc   :  { %1582 = vst.msk [vmem:[#allocation35 + $0x8] sm:$0xff] %vm497_vm2, %v1580_v12 }
 0x9dd   :  { %2543 = shalt.err (!%p2540_p4)
}
 0x9de   :  { %s2544_s6 = scalar_lea.hbm %s2788_s4, 256 }
 0x9df   :  { %p2545_p5 = scmp.ne.s32.totalorder %s2788_s4, %s2544_s6  ;;  %p2548_p6 = scmp.lt.u32.totalorder %s2544_s6, %s2788_s4 }
 0x9e1   :  { %p2550_p7 = pnand %p2548_p6, %p2545_p5 }
 0x9e3   :  { %2553 = shalt.err (!%p2550_p7)
}
 0x9e4   :  { %1594 = dma.vmem_to_hbm [thread:$0]  %s1589_s19, 256, %s2788_s4, [#allocation4], %s2620_s1, %s2620_s1, %s2621_s9  }
 0x9e5   :  { %2576 = dma.done.wait [#allocation4], 256  }
 0x9e6   :  { %2577 = vsyncadd [#allocation4], 4294967040 }
 0x9e7   :  { %1598 = vsyncpa [#allocation3], 1 }
 0x9e8   :  { %1599 = vsyncpa [#allocation6], 1 }
 0x9e9   :  { %1600 = vsyncpa [#allocation9], 1 }
 0x9ea   :  { %1601 = vsyncpa [#allocation12], 1 }
 0x9eb   :  { %1602 = vsyncpa [#allocation15], 1 }
 0x9ec   :  { %1603 = vsyncpa [#allocation18], 1 }
 0x9ed   :  { %1604 = vsyncpa [#allocation21], 1 }
 0x9ee   :  { %1605 = vsyncpa [#allocation24], 1 }
 0x9ef   :  { %1606 = vsyncpa [#allocation27], 1 }
 0x9f0   :  { %1607 = vsyncpa [#allocation30], 1 }
 0x9f1   :  { %1608 = vsyncpa [#allocation33], 1 }
 0x9f2   :  { %1609 = vsyncpa [#allocation4], 1 }

</bundles_post_ra>
